<compile_context>
chip_gen: v5e
topology: v5e:2x2
jax: 0.10.0
libtpu: 0.0.40
codegen_flags: <defaults>
</compile_context>

<pallas_src>
import jax
import jax.numpy as jnp
from jax import lax
from jax.experimental import pallas as pl
from jax.experimental.pallas import tpu as pltpu

DIM = 6        # node feature dim (x (B,N,3) repeated twice along channels -> 6)
COORD = 3
SEQ_PAD = 29   # ARNet pads the output sequence dim to 29
LANE = 128     # lane width for the lane-dense head output
N_LAYER_REFS = 15


def _silu(x):
    return x * jax.nn.sigmoid(x)


# --------------------------------------------------------------------------------------
# Fused ARNet kernel, one grid step per batch element.  All tensors transposed:
#   featsT (6, N), coorsT (3, N), maskT (1, N), pair tensors (C, P) with P = N*N on lanes.
#
# Ref order:
#   0 featsT   block (1, 6, N)       per-batch node features (channels x nodes)
#   1 coorsT   block (1, 3, N)       per-batch coordinates
#   2 maskT    block (1, 1, N)       per-batch 0/1 node mask
#   3 rep_iT   (N, P)  resident      one-hot gather  node i -> pair p   (P = N*N)
#   4 rep_jT   (N, P)  resident      one-hot gather  node j -> pair p
#   5 aggT     (P, N)  resident      pair p -> node i aggregation (= rep_i)
#   6.. 15 refs per EGNN layer (pre-transposed / zero-padded weights)
#   then wm1T, bm1T, wm2p, bm2p (head MLP; last Linear zero-padded to LANE cols)
#   last: out  block (1, 1, out_cols)
# --------------------------------------------------------------------------------------
def _make_arnet_kernel(gnn_size):

    def kernel(*refs):
        f32 = jnp.float32
        featsT = refs[0][0]          # (6, N)
        coorsT = refs[1][0]          # (3, N)
        maskT = refs[2][0]           # (1, N)
        rep_iT = refs[3][...]        # (N, P)
        rep_jT = refs[4][...]        # (N, P)
        aggT = refs[5][...]          # (P, N)
        out_ref = refs[-1]
        base = 6

        # ---- pairwise geometry & pair mask, hoisted (coords never update) ----
        # diff fused into a single gather matmul: coors^T @ (rep_i - rep_j)^T
        diffT = jnp.dot(coorsT, rep_iT - rep_jT, preferred_element_type=f32)   # (3, P)
        d2T = jnp.sum(diffT * diffT, axis=0, keepdims=True)                    # (1, P)
        mpairT = (jnp.dot(maskT, rep_iT, preferred_element_type=f32)
                  * jnp.dot(maskT, rep_jT, preferred_element_type=f32))        # (1, P)

        for l in range(gnn_size):
            (w1aT, w1bT, dwT, b1T, w2T, b2T, wgT, bgT, gammaT, betaT,
             wn1aT, wn1bT, bn1T, wn2T, bn2T) = [
                r[...] for r in refs[base + N_LAYER_REFS * l:
                                     base + N_LAYER_REFS * (l + 1)]]

            # edge MLP, first Linear decomposed per-node then gathered to pairs
            aT = jnp.dot(w1aT, featsT, preferred_element_type=f32) + b1T       # (32, N)
            bT = jnp.dot(w1bT, featsT, preferred_element_type=f32)             # (32, N)
            preT = (jnp.dot(aT, rep_iT, preferred_element_type=f32)
                    + jnp.dot(bT, rep_jT, preferred_element_type=f32)
                    + dwT * d2T)                                               # (32, P)
            h1T = _silu(preT)
            mT = _silu(jnp.dot(w2T, h1T, preferred_element_type=f32) + b2T)    # (32, P)
            gT = jax.nn.sigmoid(jnp.dot(wgT, mT, preferred_element_type=f32) + bgT)  # (1, P)
            mT = mT * (gT * mpairT)                                            # soft edges+mask
            m_iT = jnp.dot(mT, aggT, preferred_element_type=f32)               # (32, N)

            # node update: LayerNorm(feats) ++ m_i -> node MLP -> residual (all transposed)
            mu = jnp.mean(featsT, axis=0, keepdims=True)                       # (1, N)
            var = jnp.mean((featsT - mu) ** 2, axis=0, keepdims=True)
            normT = (featsT - mu) * lax.rsqrt(var + 1e-5) * gammaT + betaT     # (6, N)
            hT = _silu(jnp.dot(wn1aT, normT, preferred_element_type=f32)
                       + jnp.dot(wn1bT, m_iT, preferred_element_type=f32) + bn1T)   # (12, N)
            featsT = jnp.dot(wn2T, hT, preferred_element_type=f32) + bn2T + featsT  # (6, N)

        # ---- head: masked sum-pool over points + Linear/ReLU/Linear (lane-dense output) ----
        wm1T = refs[base + N_LAYER_REFS * gnn_size][...]       # (hidden, 6)
        bm1T = refs[base + N_LAYER_REFS * gnn_size + 1][...]   # (hidden, 1)
        wm2p = refs[base + N_LAYER_REFS * gnn_size + 2][...]   # (hidden, out_cols)
        bm2p = refs[base + N_LAYER_REFS * gnn_size + 3][...]   # (1, out_cols)

        pooledT = jnp.sum(featsT * maskT, axis=1, keepdims=True)               # (6, 1)
        hhT = jnp.maximum(jnp.dot(wm1T, pooledT, preferred_element_type=f32) + bm1T, 0.0)
        out_ref[0] = jnp.sum(hhT * wm2p, axis=0, keepdims=True) + bm2p         # (1, out_cols)

    return kernel


def _pair_matrices(N):
    """Batch-independent one-hot gather / aggregation matrices (constant-folded under jit)."""
    f32 = jnp.float32
    p = jnp.arange(N * N)
    i = p // N
    j = p % N
    rep_i = jax.nn.one_hot(i, N, dtype=f32)      # (P, N)
    rep_j = jax.nn.one_hot(j, N, dtype=f32)      # (P, N)
    return rep_i.T, rep_j.T, rep_i               # rep_iT (N,P), rep_jT (N,P), aggT (P,N)


def _prep_layer(lp, d=DIM):
    """Pre-transpose + zero-pad one EGNN layer's weights for the transposed kernel layout."""
    f32 = jnp.float32
    w1, b1, w2 = lp["w1"], lp["b1"], lp["w2"]
    eh = w1.shape[1]                    # edge hidden = 2*(2d+1) = 26
    ehp = ((eh + 7) // 8) * 8           # padded to 32 sublanes (exact: padded rows/cols are 0)
    m_dim = w2.shape[1]
    w1aT = jnp.zeros((ehp, d), f32).at[:eh].set(w1[0:d].T)              # feats_i part
    w1bT = jnp.zeros((ehp, d), f32).at[:eh].set(w1[d:2 * d].T)          # feats_j part
    dwT = jnp.zeros((ehp, 1), f32).at[:eh].set(w1[2 * d:2 * d + 1].T)   # rel_dist part
    b1T = jnp.zeros((ehp, 1), f32).at[:eh].set(b1.T)
    w2T = jnp.zeros((m_dim, ehp), f32).at[:, :eh].set(w2.T)
    return [w1aT, w1bT, dwT, b1T, w2T, lp["b2"].T, lp["wg"].T, lp["bg"].T,
            lp["gamma"].T, lp["beta"].T,
            lp["wn1"][:d].T, lp["wn1"][d:].T, lp["bn1"].T,
            lp["wn2"].T, lp["bn2"].T]


# --------------------------------------------------------------------------------------
# Parameter init (deterministic, synthetic) + full ARNet forward.
# --------------------------------------------------------------------------------------
def init_params(key, hidden_dim=32, gnn_size=1, idx=(0, 2), dim=DIM):
    def linear(k, din, dout):
        kw, kb = jax.random.split(k)
        w = jax.random.normal(kw, (din, dout), jnp.float32) * (1.0 / jnp.sqrt(din))
        b = jax.random.normal(kb, (1, dout), jnp.float32) * 0.01
        return w, b

    keys = iter(jax.random.split(key, 8 * gnn_size + 4))
    m_dim = hidden_dim
    edge_in = 2 * dim + 1   # feats_i (6) + feats_j (6) + rel_dist (1) = 13
    gnn = []
    for _ in range(gnn_size):
        w1, b1 = linear(next(keys), edge_in, edge_in * 2)
        w2, b2 = linear(next(keys), edge_in * 2, m_dim)
        wg, bg = linear(next(keys), m_dim, 1)
        wn1, bn1 = linear(next(keys), dim + m_dim, dim * 2)
        wn2, bn2 = linear(next(keys), dim * 2, dim)
        gnn.append(dict(w1=w1, b1=b1, w2=w2, b2=b2, wg=wg, bg=bg,
                        gamma=jnp.ones((1, dim), jnp.float32),
                        beta=jnp.zeros((1, dim), jnp.float32),
                        wn1=wn1, bn1=bn1, wn2=wn2, bn2=bn2))
    k = idx[1] - idx[0]
    wm1, bm1 = linear(next(keys), dim, hidden_dim)
    wm2, bm2 = linear(next(keys), hidden_dim, k * dim)
    return dict(gnn=gnn, mlp=dict(wm1=wm1, bm1=bm1, wm2=wm2, bm2=bm2), idx=idx)


def arnet_forward(params, x, mask):
    B, N, _ = x.shape
    P = N * N
    idx = params["idx"]
    k = idx[1] - idx[0]
    out_cols = max(LANE, ((k * DIM + LANE - 1) // LANE) * LANE)   # lane-dense output width

    # JAX glue: transpose to channels-on-sublanes layouts.
    xT = jnp.transpose(x, (0, 2, 1))                              # (B, 3, N)
    featsT = jnp.concatenate([xT, xT], axis=1)                    # x.repeat(1,1,2) -> (B, 6, N)
    coorsT = xT
    maskT = mask.astype(jnp.float32).reshape(B, 1, N)             # (B, 1, N)
    rep_iT, rep_jT, aggT = _pair_matrices(N)

    mlp = params["mlp"]
    wm1T = mlp["wm1"].T                                           # (hidden, 6)
    bm1T = mlp["bm1"].T                                           # (hidden, 1)
    # zero-pad the last Linear to a lane-dense (…,128) output; extra columns are exact zeros.
    wm2p = jnp.zeros((mlp["wm2"].shape[0], out_cols), jnp.float32).at[:, :k * DIM].set(mlp["wm2"])
    bm2p = jnp.zeros((1, out_cols), jnp.float32).at[:, :k * DIM].set(mlp["bm2"])

    layer_args = []
    for lp in params["gnn"]:
        layer_args += _prep_layer(lp)

    gnn_size = len(params["gnn"])
    kernel = _make_arnet_kernel(gnn_size)

    args = [featsT, coorsT, maskT, rep_iT, rep_jT, aggT,
            *layer_args, wm1T, bm1T, wm2p, bm2p]

    in_specs = [
        pl.BlockSpec((1, DIM, N), lambda b: (b, 0, 0)),       # featsT
        pl.BlockSpec((1, COORD, N), lambda b: (b, 0, 0)),     # coorsT
        pl.BlockSpec((1, 1, N), lambda b: (b, 0, 0)),         # maskT
    ]
    # pair matrices + all weights: full-array blocks, constant index -> VMEM-resident.
    in_specs += [pl.BlockSpec(a.shape, lambda b: (0, 0)) for a in args[3:]]

    out_pad = pl.pallas_call(
        kernel,
        out_shape=jax.ShapeDtypeStruct((B, 1, out_cols), jnp.float32),
        grid=(B,),
        in_specs=in_specs,
        out_specs=pl.BlockSpec((1, 1, out_cols), lambda b: (b, 0, 0)),
        compiler_params=pltpu.CompilerParams(
            dimension_semantics=("parallel",),
            vmem_limit_bytes=32 * 1024 * 1024),
    )(*args)

    out = out_pad[:, 0, :k * DIM].reshape(B, k, DIM)
    out = jnp.pad(out, ((0, 0), (idx[0], SEQ_PAD - idx[1]), (0, 0)))   # (B, 29, 6)
    return out


if __name__ == "__main__":
    key = jax.random.PRNGKey(0)
    k_param, k_x = jax.random.split(key)

    B, N = 2, 16
    params = init_params(k_param, hidden_dim=32, gnn_size=1, idx=(0, 2))
    x = jax.random.normal(k_x, (B, N, COORD), jnp.float32)
    valid = jnp.array([N, N - 4])
    mask = (jnp.arange(N)[None, :] < valid[:, None]).astype(jnp.float32)   # (B, N) 0/1

    fwd = jax.jit(lambda xx, mm: arnet_forward(params, xx, mm))
    out = fwd(x, mask)
    out = jax.block_until_ready(out)
    assert out.shape == (B, SEQ_PAD, DIM)
    assert bool(jnp.isfinite(out).all())
    print("KERNEL_OK")
</pallas_src>

<mosaic_0001>
module attributes {stable_mosaic.version = 11 : i64} {
  func.func @kernel(%arg0: i32, %arg1: memref<1x6x16xf32, #tpu.memory_space<vmem>>, %arg2: memref<1x3x16xf32, #tpu.memory_space<vmem>>, %arg3: memref<1x1x16xf32, #tpu.memory_space<vmem>>, %arg4: memref<16x256xf32, #tpu.memory_space<vmem>>, %arg5: memref<16x256xf32, #tpu.memory_space<vmem>>, %arg6: memref<256x16xf32, #tpu.memory_space<vmem>>, %arg7: memref<32x6xf32, #tpu.memory_space<vmem>>, %arg8: memref<32x6xf32, #tpu.memory_space<vmem>>, %arg9: memref<32x1xf32, #tpu.memory_space<vmem>>, %arg10: memref<32x1xf32, #tpu.memory_space<vmem>>, %arg11: memref<32x32xf32, #tpu.memory_space<vmem>>, %arg12: memref<32x1xf32, #tpu.memory_space<vmem>>, %arg13: memref<1x32xf32, #tpu.memory_space<vmem>>, %arg14: memref<1x1xf32, #tpu.memory_space<vmem>>, %arg15: memref<6x1xf32, #tpu.memory_space<vmem>>, %arg16: memref<6x1xf32, #tpu.memory_space<vmem>>, %arg17: memref<12x6xf32, #tpu.memory_space<vmem>>, %arg18: memref<12x32xf32, #tpu.memory_space<vmem>>, %arg19: memref<12x1xf32, #tpu.memory_space<vmem>>, %arg20: memref<6x12xf32, #tpu.memory_space<vmem>>, %arg21: memref<6x1xf32, #tpu.memory_space<vmem>>, %arg22: memref<32x6xf32, #tpu.memory_space<vmem>>, %arg23: memref<32x1xf32, #tpu.memory_space<vmem>>, %arg24: memref<32x128xf32, #tpu.memory_space<vmem>>, %arg25: memref<1x128xf32, #tpu.memory_space<vmem>>, %arg26: memref<1x1x128xf32, #tpu.memory_space<vmem>>) attributes {dimension_semantics = [#tpu.dimension_semantics<parallel>], iteration_bounds = array<i64: 2>, scalar_prefetch = 0 : i64, scratch_operands = 0 : i64, tpu.core_type = #tpu.core_type<tc>, window_params = [{transform_indices = @transform_0, window_bounds = array<i64: 1, 6, 16>}, {transform_indices = @transform_1, window_bounds = array<i64: 1, 3, 16>}, {transform_indices = @transform_2, window_bounds = array<i64: 1, 1, 16>}, {pipeline_mode = #tpu.pipeline_mode<synchronous>, transform_indices = @transform_3, window_bounds = array<i64: 16, 256>}, {pipeline_mode = #tpu.pipeline_mode<synchronous>, transform_indices = @transform_4, window_bounds = array<i64: 16, 256>}, {pipeline_mode = #tpu.pipeline_mode<synchronous>, transform_indices = @transform_5, window_bounds = array<i64: 256, 16>}, {pipeline_mode = #tpu.pipeline_mode<synchronous>, transform_indices = @transform_6, window_bounds = array<i64: 32, 6>}, {pipeline_mode = #tpu.pipeline_mode<synchronous>, transform_indices = @transform_7, window_bounds = array<i64: 32, 6>}, {pipeline_mode = #tpu.pipeline_mode<synchronous>, transform_indices = @transform_8, window_bounds = array<i64: 32, 1>}, {pipeline_mode = #tpu.pipeline_mode<synchronous>, transform_indices = @transform_9, window_bounds = array<i64: 32, 1>}, {pipeline_mode = #tpu.pipeline_mode<synchronous>, transform_indices = @transform_10, window_bounds = array<i64: 32, 32>}, {pipeline_mode = #tpu.pipeline_mode<synchronous>, transform_indices = @transform_11, window_bounds = array<i64: 32, 1>}, {pipeline_mode = #tpu.pipeline_mode<synchronous>, transform_indices = @transform_12, window_bounds = array<i64: 1, 32>}, {pipeline_mode = #tpu.pipeline_mode<synchronous>, transform_indices = @transform_13, window_bounds = array<i64: 1, 1>}, {pipeline_mode = #tpu.pipeline_mode<synchronous>, transform_indices = @transform_14, window_bounds = array<i64: 6, 1>}, {pipeline_mode = #tpu.pipeline_mode<synchronous>, transform_indices = @transform_15, window_bounds = array<i64: 6, 1>}, {pipeline_mode = #tpu.pipeline_mode<synchronous>, transform_indices = @transform_16, window_bounds = array<i64: 12, 6>}, {pipeline_mode = #tpu.pipeline_mode<synchronous>, transform_indices = @transform_17, window_bounds = array<i64: 12, 32>}, {pipeline_mode = #tpu.pipeline_mode<synchronous>, transform_indices = @transform_18, window_bounds = array<i64: 12, 1>}, {pipeline_mode = #tpu.pipeline_mode<synchronous>, transform_indices = @transform_19, window_bounds = array<i64: 6, 12>}, {pipeline_mode = #tpu.pipeline_mode<synchronous>, transform_indices = @transform_20, window_bounds = array<i64: 6, 1>}, {pipeline_mode = #tpu.pipeline_mode<synchronous>, transform_indices = @transform_21, window_bounds = array<i64: 32, 6>}, {pipeline_mode = #tpu.pipeline_mode<synchronous>, transform_indices = @transform_22, window_bounds = array<i64: 32, 1>}, {pipeline_mode = #tpu.pipeline_mode<synchronous>, transform_indices = @transform_23, window_bounds = array<i64: 32, 128>}, {pipeline_mode = #tpu.pipeline_mode<synchronous>, transform_indices = @transform_24, window_bounds = array<i64: 1, 128>}, {transform_indices = @transform_25, window_bounds = array<i64: 1, 1, 128>}]} {
    %c0 = arith.constant 0 : index
    %c0_0 = arith.constant 0 : index
    %c0_1 = arith.constant 0 : index
    %0 = vector.load %arg1[%c0, %c0_0, %c0_1] : memref<1x6x16xf32, #tpu.memory_space<vmem>>, vector<1x6x16xf32>
    %1 = vector.shape_cast %0 : vector<1x6x16xf32> to vector<6x16xf32>
    %c0_2 = arith.constant 0 : index
    %c0_3 = arith.constant 0 : index
    %c0_4 = arith.constant 0 : index
    %2 = vector.load %arg2[%c0_2, %c0_3, %c0_4] : memref<1x3x16xf32, #tpu.memory_space<vmem>>, vector<1x3x16xf32>
    %3 = vector.shape_cast %2 : vector<1x3x16xf32> to vector<3x16xf32>
    %c0_5 = arith.constant 0 : index
    %c0_6 = arith.constant 0 : index
    %c0_7 = arith.constant 0 : index
    %4 = vector.load %arg3[%c0_5, %c0_6, %c0_7] : memref<1x1x16xf32, #tpu.memory_space<vmem>>, vector<1x1x16xf32>
    %5 = vector.shape_cast %4 : vector<1x1x16xf32> to vector<1x16xf32>
    %c0_8 = arith.constant 0 : index
    %c0_9 = arith.constant 0 : index
    %6 = vector.load %arg4[%c0_8, %c0_9] : memref<16x256xf32, #tpu.memory_space<vmem>>, vector<16x256xf32>
    %c0_10 = arith.constant 0 : index
    %c0_11 = arith.constant 0 : index
    %7 = vector.load %arg5[%c0_10, %c0_11] : memref<16x256xf32, #tpu.memory_space<vmem>>, vector<16x256xf32>
    %c0_12 = arith.constant 0 : index
    %c0_13 = arith.constant 0 : index
    %8 = vector.load %arg6[%c0_12, %c0_13] : memref<256x16xf32, #tpu.memory_space<vmem>>, vector<256x16xf32>
    %9 = arith.subf %6, %7 : vector<16x256xf32>
    %cst = arith.constant dense<0.000000e+00> : vector<3x256xf32>
    %10 = tpu.matmul %3, %9, %cst {dimension_numbers = #tpu.dot_dimension_numbers<[1], [0], [0], [1], [0, 0, 1, 1], [], []>} : vector<3x16xf32>, vector<16x256xf32>, vector<3x256xf32> -> vector<3x256xf32>
    %11 = arith.mulf %10, %10 : vector<3x256xf32>
    %cst_14 = arith.constant dense<0.000000e+00> : vector<256xf32>
    %12 = vector.multi_reduction <add>, %11, %cst_14 [0] : vector<3x256xf32> to vector<256xf32>
    %13 = vector.shape_cast %12 : vector<256xf32> to vector<1x256xf32>
    %cst_15 = arith.constant dense<0.000000e+00> : vector<1x256xf32>
    %14 = tpu.matmul %5, %6, %cst_15 {dimension_numbers = #tpu.dot_dimension_numbers<[1], [0], [0], [1], [0, 0, 1, 1], [], []>} : vector<1x16xf32>, vector<16x256xf32>, vector<1x256xf32> -> vector<1x256xf32>
    %cst_16 = arith.constant dense<0.000000e+00> : vector<1x256xf32>
    %15 = tpu.matmul %5, %7, %cst_16 {dimension_numbers = #tpu.dot_dimension_numbers<[1], [0], [0], [1], [0, 0, 1, 1], [], []>} : vector<1x16xf32>, vector<16x256xf32>, vector<1x256xf32> -> vector<1x256xf32>
    %16 = arith.mulf %14, %15 : vector<1x256xf32>
    %c0_17 = arith.constant 0 : index
    %c0_18 = arith.constant 0 : index
    %17 = vector.load %arg7[%c0_17, %c0_18] : memref<32x6xf32, #tpu.memory_space<vmem>>, vector<32x6xf32>
    %c0_19 = arith.constant 0 : index
    %c0_20 = arith.constant 0 : index
    %18 = vector.load %arg8[%c0_19, %c0_20] : memref<32x6xf32, #tpu.memory_space<vmem>>, vector<32x6xf32>
    %c0_21 = arith.constant 0 : index
    %c0_22 = arith.constant 0 : index
    %19 = vector.load %arg9[%c0_21, %c0_22] : memref<32x1xf32, #tpu.memory_space<vmem>>, vector<32x1xf32>
    %c0_23 = arith.constant 0 : index
    %c0_24 = arith.constant 0 : index
    %20 = vector.load %arg10[%c0_23, %c0_24] : memref<32x1xf32, #tpu.memory_space<vmem>>, vector<32x1xf32>
    %c0_25 = arith.constant 0 : index
    %c0_26 = arith.constant 0 : index
    %21 = vector.load %arg11[%c0_25, %c0_26] : memref<32x32xf32, #tpu.memory_space<vmem>>, vector<32x32xf32>
    %c0_27 = arith.constant 0 : index
    %c0_28 = arith.constant 0 : index
    %22 = vector.load %arg12[%c0_27, %c0_28] : memref<32x1xf32, #tpu.memory_space<vmem>>, vector<32x1xf32>
    %c0_29 = arith.constant 0 : index
    %c0_30 = arith.constant 0 : index
    %23 = vector.load %arg13[%c0_29, %c0_30] : memref<1x32xf32, #tpu.memory_space<vmem>>, vector<1x32xf32>
    %c0_31 = arith.constant 0 : index
    %c0_32 = arith.constant 0 : index
    %24 = vector.load %arg14[%c0_31, %c0_32] : memref<1x1xf32, #tpu.memory_space<vmem>>, vector<1x1xf32>
    %c0_33 = arith.constant 0 : index
    %c0_34 = arith.constant 0 : index
    %25 = vector.load %arg15[%c0_33, %c0_34] : memref<6x1xf32, #tpu.memory_space<vmem>>, vector<6x1xf32>
    %c0_35 = arith.constant 0 : index
    %c0_36 = arith.constant 0 : index
    %26 = vector.load %arg16[%c0_35, %c0_36] : memref<6x1xf32, #tpu.memory_space<vmem>>, vector<6x1xf32>
    %c0_37 = arith.constant 0 : index
    %c0_38 = arith.constant 0 : index
    %27 = vector.load %arg17[%c0_37, %c0_38] : memref<12x6xf32, #tpu.memory_space<vmem>>, vector<12x6xf32>
    %c0_39 = arith.constant 0 : index
    %c0_40 = arith.constant 0 : index
    %28 = vector.load %arg18[%c0_39, %c0_40] : memref<12x32xf32, #tpu.memory_space<vmem>>, vector<12x32xf32>
    %c0_41 = arith.constant 0 : index
    %c0_42 = arith.constant 0 : index
    %29 = vector.load %arg19[%c0_41, %c0_42] : memref<12x1xf32, #tpu.memory_space<vmem>>, vector<12x1xf32>
    %c0_43 = arith.constant 0 : index
    %c0_44 = arith.constant 0 : index
    %30 = vector.load %arg20[%c0_43, %c0_44] : memref<6x12xf32, #tpu.memory_space<vmem>>, vector<6x12xf32>
    %c0_45 = arith.constant 0 : index
    %c0_46 = arith.constant 0 : index
    %31 = vector.load %arg21[%c0_45, %c0_46] : memref<6x1xf32, #tpu.memory_space<vmem>>, vector<6x1xf32>
    %cst_47 = arith.constant dense<0.000000e+00> : vector<32x16xf32>
    %32 = tpu.matmul %17, %1, %cst_47 {dimension_numbers = #tpu.dot_dimension_numbers<[1], [0], [0], [1], [0, 0, 1, 1], [], []>} : vector<32x6xf32>, vector<6x16xf32>, vector<32x16xf32> -> vector<32x16xf32>
    %33 = vector.broadcast %20 : vector<32x1xf32> to vector<32x16xf32>
    %34 = arith.addf %32, %33 : vector<32x16xf32>
    %cst_48 = arith.constant dense<0.000000e+00> : vector<32x16xf32>
    %35 = tpu.matmul %18, %1, %cst_48 {dimension_numbers = #tpu.dot_dimension_numbers<[1], [0], [0], [1], [0, 0, 1, 1], [], []>} : vector<32x6xf32>, vector<6x16xf32>, vector<32x16xf32> -> vector<32x16xf32>
    %cst_49 = arith.constant dense<0.000000e+00> : vector<32x256xf32>
    %36 = tpu.matmul %34, %6, %cst_49 {dimension_numbers = #tpu.dot_dimension_numbers<[1], [0], [0], [1], [0, 0, 1, 1], [], []>} : vector<32x16xf32>, vector<16x256xf32>, vector<32x256xf32> -> vector<32x256xf32>
    %cst_50 = arith.constant dense<0.000000e+00> : vector<32x256xf32>
    %37 = tpu.matmul %35, %7, %cst_50 {dimension_numbers = #tpu.dot_dimension_numbers<[1], [0], [0], [1], [0, 0, 1, 1], [], []>} : vector<32x16xf32>, vector<16x256xf32>, vector<32x256xf32> -> vector<32x256xf32>
    %38 = arith.addf %36, %37 : vector<32x256xf32>
    %39 = vector.broadcast %19 : vector<32x1xf32> to vector<32x256xf32>
    %40 = vector.broadcast %13 : vector<1x256xf32> to vector<32x256xf32>
    %41 = arith.mulf %39, %40 : vector<32x256xf32>
    %42 = arith.addf %38, %41 : vector<32x256xf32>
    %43 = arith.negf %42 : vector<32x256xf32>
    %44 = math.exp %43 : vector<32x256xf32>
    %cst_51 = arith.constant 1.000000e+00 : f32
    %45 = vector.broadcast %cst_51 : f32 to vector<32x256xf32>
    %46 = arith.addf %45, %44 : vector<32x256xf32>
    %47 = arith.divf %45, %46 : vector<32x256xf32>
    %48 = arith.mulf %42, %47 : vector<32x256xf32>
    %cst_52 = arith.constant dense<0.000000e+00> : vector<32x256xf32>
    %49 = tpu.matmul %21, %48, %cst_52 {dimension_numbers = #tpu.dot_dimension_numbers<[1], [0], [0], [1], [0, 0, 1, 1], [], []>} : vector<32x32xf32>, vector<32x256xf32>, vector<32x256xf32> -> vector<32x256xf32>
    %50 = vector.broadcast %22 : vector<32x1xf32> to vector<32x256xf32>
    %51 = arith.addf %49, %50 : vector<32x256xf32>
    %52 = arith.negf %51 : vector<32x256xf32>
    %53 = math.exp %52 : vector<32x256xf32>
    %cst_53 = arith.constant 1.000000e+00 : f32
    %54 = vector.broadcast %cst_53 : f32 to vector<32x256xf32>
    %55 = arith.addf %54, %53 : vector<32x256xf32>
    %56 = arith.divf %54, %55 : vector<32x256xf32>
    %57 = arith.mulf %51, %56 : vector<32x256xf32>
    %cst_54 = arith.constant dense<0.000000e+00> : vector<1x256xf32>
    %58 = tpu.matmul %23, %57, %cst_54 {dimension_numbers = #tpu.dot_dimension_numbers<[1], [0], [0], [1], [0, 0, 1, 1], [], []>} : vector<1x32xf32>, vector<32x256xf32>, vector<1x256xf32> -> vector<1x256xf32>
    %59 = vector.broadcast %24 : vector<1x1xf32> to vector<1x256xf32>
    %60 = arith.addf %58, %59 : vector<1x256xf32>
    %61 = arith.negf %60 : vector<1x256xf32>
    %62 = math.exp %61 : vector<1x256xf32>
    %cst_55 = arith.constant 1.000000e+00 : f32
    %63 = vector.broadcast %cst_55 : f32 to vector<1x256xf32>
    %64 = arith.addf %63, %62 : vector<1x256xf32>
    %65 = arith.divf %63, %64 : vector<1x256xf32>
    %66 = arith.mulf %65, %16 : vector<1x256xf32>
    %67 = vector.broadcast %66 : vector<1x256xf32> to vector<32x256xf32>
    %68 = arith.mulf %57, %67 : vector<32x256xf32>
    %cst_56 = arith.constant dense<0.000000e+00> : vector<32x16xf32>
    %69 = tpu.matmul %68, %8, %cst_56 {dimension_numbers = #tpu.dot_dimension_numbers<[1], [0], [0], [1], [0, 0, 1, 1], [], []>} : vector<32x256xf32>, vector<256x16xf32>, vector<32x16xf32> -> vector<32x16xf32>
    %cst_57 = arith.constant dense<0.000000e+00> : vector<16xf32>
    %70 = vector.multi_reduction <add>, %1, %cst_57 [0] : vector<6x16xf32> to vector<16xf32>
    %71 = vector.shape_cast %70 : vector<16xf32> to vector<1x16xf32>
    %cst_58 = arith.constant 6.000000e+00 : f32
    %72 = vector.broadcast %cst_58 : f32 to vector<1x16xf32>
    %73 = arith.divf %71, %72 : vector<1x16xf32>
    %74 = vector.broadcast %73 : vector<1x16xf32> to vector<6x16xf32>
    %75 = arith.subf %1, %74 : vector<6x16xf32>
    %76 = arith.mulf %75, %75 : vector<6x16xf32>
    %cst_59 = arith.constant dense<0.000000e+00> : vector<16xf32>
    %77 = vector.multi_reduction <add>, %76, %cst_59 [0] : vector<6x16xf32> to vector<16xf32>
    %78 = vector.shape_cast %77 : vector<16xf32> to vector<1x16xf32>
    %cst_60 = arith.constant 6.000000e+00 : f32
    %79 = vector.broadcast %cst_60 : f32 to vector<1x16xf32>
    %80 = arith.divf %78, %79 : vector<1x16xf32>
    %81 = vector.broadcast %73 : vector<1x16xf32> to vector<6x16xf32>
    %82 = arith.subf %1, %81 : vector<6x16xf32>
    %cst_61 = arith.constant 9.99999974E-6 : f32
    %83 = vector.broadcast %cst_61 : f32 to vector<1x16xf32>
    %84 = arith.addf %80, %83 : vector<1x16xf32>
    %85 = math.rsqrt %84 : vector<1x16xf32>
    %86 = vector.broadcast %85 : vector<1x16xf32> to vector<6x16xf32>
    %87 = arith.mulf %82, %86 : vector<6x16xf32>
    %88 = vector.broadcast %25 : vector<6x1xf32> to vector<6x16xf32>
    %89 = arith.mulf %87, %88 : vector<6x16xf32>
    %90 = vector.broadcast %26 : vector<6x1xf32> to vector<6x16xf32>
    %91 = arith.addf %89, %90 : vector<6x16xf32>
    %cst_62 = arith.constant dense<0.000000e+00> : vector<12x16xf32>
    %92 = tpu.matmul %27, %91, %cst_62 {dimension_numbers = #tpu.dot_dimension_numbers<[1], [0], [0], [1], [0, 0, 1, 1], [], []>} : vector<12x6xf32>, vector<6x16xf32>, vector<12x16xf32> -> vector<12x16xf32>
    %cst_63 = arith.constant dense<0.000000e+00> : vector<12x16xf32>
    %93 = tpu.matmul %28, %69, %cst_63 {dimension_numbers = #tpu.dot_dimension_numbers<[1], [0], [0], [1], [0, 0, 1, 1], [], []>} : vector<12x32xf32>, vector<32x16xf32>, vector<12x16xf32> -> vector<12x16xf32>
    %94 = arith.addf %92, %93 : vector<12x16xf32>
    %95 = vector.broadcast %29 : vector<12x1xf32> to vector<12x16xf32>
    %96 = arith.addf %94, %95 : vector<12x16xf32>
    %97 = arith.negf %96 : vector<12x16xf32>
    %98 = math.exp %97 : vector<12x16xf32>
    %cst_64 = arith.constant 1.000000e+00 : f32
    %99 = vector.broadcast %cst_64 : f32 to vector<12x16xf32>
    %100 = arith.addf %99, %98 : vector<12x16xf32>
    %101 = arith.divf %99, %100 : vector<12x16xf32>
    %102 = arith.mulf %96, %101 : vector<12x16xf32>
    %cst_65 = arith.constant dense<0.000000e+00> : vector<6x16xf32>
    %103 = tpu.matmul %30, %102, %cst_65 {dimension_numbers = #tpu.dot_dimension_numbers<[1], [0], [0], [1], [0, 0, 1, 1], [], []>} : vector<6x12xf32>, vector<12x16xf32>, vector<6x16xf32> -> vector<6x16xf32>
    %104 = vector.broadcast %31 : vector<6x1xf32> to vector<6x16xf32>
    %105 = arith.addf %103, %104 : vector<6x16xf32>
    %106 = arith.addf %105, %1 : vector<6x16xf32>
    %c0_66 = arith.constant 0 : index
    %c0_67 = arith.constant 0 : index
    %107 = vector.load %arg22[%c0_66, %c0_67] : memref<32x6xf32, #tpu.memory_space<vmem>>, vector<32x6xf32>
    %c0_68 = arith.constant 0 : index
    %c0_69 = arith.constant 0 : index
    %108 = vector.load %arg23[%c0_68, %c0_69] : memref<32x1xf32, #tpu.memory_space<vmem>>, vector<32x1xf32>
    %c0_70 = arith.constant 0 : index
    %c0_71 = arith.constant 0 : index
    %109 = vector.load %arg24[%c0_70, %c0_71] : memref<32x128xf32, #tpu.memory_space<vmem>>, vector<32x128xf32>
    %c0_72 = arith.constant 0 : index
    %c0_73 = arith.constant 0 : index
    %110 = vector.load %arg25[%c0_72, %c0_73] : memref<1x128xf32, #tpu.memory_space<vmem>>, vector<1x128xf32>
    %111 = vector.broadcast %5 : vector<1x16xf32> to vector<6x16xf32>
    %112 = arith.mulf %106, %111 : vector<6x16xf32>
    %cst_74 = arith.constant dense<0.000000e+00> : vector<6xf32>
    %113 = vector.multi_reduction <add>, %112, %cst_74 [1] : vector<6x16xf32> to vector<6xf32>
    %114 = vector.shape_cast %113 : vector<6xf32> to vector<6x1xf32>
    %cst_75 = arith.constant dense<0.000000e+00> : vector<32x1xf32>
    %115 = tpu.matmul %107, %114, %cst_75 {dimension_numbers = #tpu.dot_dimension_numbers<[1], [0], [0], [1], [0, 0, 1, 1], [], []>} : vector<32x6xf32>, vector<6x1xf32>, vector<32x1xf32> -> vector<32x1xf32>
    %116 = arith.addf %115, %108 : vector<32x1xf32>
    %cst_76 = arith.constant 0.000000e+00 : f32
    %117 = vector.broadcast %cst_76 : f32 to vector<32x1xf32>
    %118 = arith.maximumf %116, %117 : vector<32x1xf32>
    %119 = vector.broadcast %118 : vector<32x1xf32> to vector<32x128xf32>
    %120 = arith.mulf %119, %109 : vector<32x128xf32>
    %cst_77 = arith.constant dense<0.000000e+00> : vector<128xf32>
    %121 = vector.multi_reduction <add>, %120, %cst_77 [0] : vector<32x128xf32> to vector<128xf32>
    %122 = vector.shape_cast %121 : vector<128xf32> to vector<1x128xf32>
    %123 = arith.addf %122, %110 : vector<1x128xf32>
    %c0_78 = arith.constant 0 : index
    %c0_79 = arith.constant 0 : index
    %c0_80 = arith.constant 0 : index
    %124 = vector.load %arg26[%c0_78, %c0_79, %c0_80] : memref<1x1x128xf32, #tpu.memory_space<vmem>>, vector<1x1x128xf32>
    %125 = vector.shape_cast %124 : vector<1x1x128xf32> to vector<1x128xf32>
    %126 = vector.shape_cast %123 : vector<1x128xf32> to vector<1x1x128xf32>
    tpu.vector_store %arg26[%c0_78, %c0_79, %c0_80], %126 {strides = array<i32>} : memref<1x1x128xf32, #tpu.memory_space<vmem>>, vector<1x1x128xf32>,
    return
  }
  func.func @transform_0(%arg0: i32) -> (i32, i32, i32) {
    %c0_i32 = arith.constant 0 : i32
    %c0_i32_0 = arith.constant 0 : i32
    %c0_i32_1 = arith.constant 0 : i32
    return %arg0, %c0_i32, %c0_i32_0 : i32, i32, i32
  }
  func.func @transform_1(%arg0: i32) -> (i32, i32, i32) {
    %c0_i32 = arith.constant 0 : i32
    %c0_i32_0 = arith.constant 0 : i32
    %c0_i32_1 = arith.constant 0 : i32
    return %arg0, %c0_i32, %c0_i32_0 : i32, i32, i32
  }
  func.func @transform_2(%arg0: i32) -> (i32, i32, i32) {
    %c0_i32 = arith.constant 0 : i32
    %c0_i32_0 = arith.constant 0 : i32
    %c0_i32_1 = arith.constant 0 : i32
    return %arg0, %c0_i32, %c0_i32_0 : i32, i32, i32
  }
  func.func @transform_3(%arg0: i32) -> (i32, i32) {
    %c0_i32 = arith.constant 0 : i32
    %c0_i32_0 = arith.constant 0 : i32
    %c0_i32_1 = arith.constant 0 : i32
    return %c0_i32, %c0_i32_0 : i32, i32
  }
  func.func @transform_4(%arg0: i32) -> (i32, i32) {
    %c0_i32 = arith.constant 0 : i32
    %c0_i32_0 = arith.constant 0 : i32
    %c0_i32_1 = arith.constant 0 : i32
    return %c0_i32, %c0_i32_0 : i32, i32
  }
  func.func @transform_5(%arg0: i32) -> (i32, i32) {
    %c0_i32 = arith.constant 0 : i32
    %c0_i32_0 = arith.constant 0 : i32
    %c0_i32_1 = arith.constant 0 : i32
    return %c0_i32, %c0_i32_0 : i32, i32
  }
  func.func @transform_6(%arg0: i32) -> (i32, i32) {
    %c0_i32 = arith.constant 0 : i32
    %c0_i32_0 = arith.constant 0 : i32
    %c0_i32_1 = arith.constant 0 : i32
    return %c0_i32, %c0_i32_0 : i32, i32
  }
  func.func @transform_7(%arg0: i32) -> (i32, i32) {
    %c0_i32 = arith.constant 0 : i32
    %c0_i32_0 = arith.constant 0 : i32
    %c0_i32_1 = arith.constant 0 : i32
    return %c0_i32, %c0_i32_0 : i32, i32
  }
  func.func @transform_8(%arg0: i32) -> (i32, i32) {
    %c0_i32 = arith.constant 0 : i32
    %c0_i32_0 = arith.constant 0 : i32
    %c0_i32_1 = arith.constant 0 : i32
    return %c0_i32, %c0_i32_0 : i32, i32
  }
  func.func @transform_9(%arg0: i32) -> (i32, i32) {
    %c0_i32 = arith.constant 0 : i32
    %c0_i32_0 = arith.constant 0 : i32
    %c0_i32_1 = arith.constant 0 : i32
    return %c0_i32, %c0_i32_0 : i32, i32
  }
  func.func @transform_10(%arg0: i32) -> (i32, i32) {
    %c0_i32 = arith.constant 0 : i32
    %c0_i32_0 = arith.constant 0 : i32
    %c0_i32_1 = arith.constant 0 : i32
    return %c0_i32, %c0_i32_0 : i32, i32
  }
  func.func @transform_11(%arg0: i32) -> (i32, i32) {
    %c0_i32 = arith.constant 0 : i32
    %c0_i32_0 = arith.constant 0 : i32
    %c0_i32_1 = arith.constant 0 : i32
    return %c0_i32, %c0_i32_0 : i32, i32
  }
  func.func @transform_12(%arg0: i32) -> (i32, i32) {
    %c0_i32 = arith.constant 0 : i32
    %c0_i32_0 = arith.constant 0 : i32
    %c0_i32_1 = arith.constant 0 : i32
    return %c0_i32, %c0_i32_0 : i32, i32
  }
  func.func @transform_13(%arg0: i32) -> (i32, i32) {
    %c0_i32 = arith.constant 0 : i32
    %c0_i32_0 = arith.constant 0 : i32
    %c0_i32_1 = arith.constant 0 : i32
    return %c0_i32, %c0_i32_0 : i32, i32
  }
  func.func @transform_14(%arg0: i32) -> (i32, i32) {
    %c0_i32 = arith.constant 0 : i32
    %c0_i32_0 = arith.constant 0 : i32
    %c0_i32_1 = arith.constant 0 : i32
    return %c0_i32, %c0_i32_0 : i32, i32
  }
  func.func @transform_15(%arg0: i32) -> (i32, i32) {
    %c0_i32 = arith.constant 0 : i32
    %c0_i32_0 = arith.constant 0 : i32
    %c0_i32_1 = arith.constant 0 : i32
    return %c0_i32, %c0_i32_0 : i32, i32
  }
  func.func @transform_16(%arg0: i32) -> (i32, i32) {
    %c0_i32 = arith.constant 0 : i32
    %c0_i32_0 = arith.constant 0 : i32
    %c0_i32_1 = arith.constant 0 : i32
    return %c0_i32, %c0_i32_0 : i32, i32
  }
  func.func @transform_17(%arg0: i32) -> (i32, i32) {
    %c0_i32 = arith.constant 0 : i32
    %c0_i32_0 = arith.constant 0 : i32
    %c0_i32_1 = arith.constant 0 : i32
    return %c0_i32, %c0_i32_0 : i32, i32
  }
  func.func @transform_18(%arg0: i32) -> (i32, i32) {
    %c0_i32 = arith.constant 0 : i32
    %c0_i32_0 = arith.constant 0 : i32
    %c0_i32_1 = arith.constant 0 : i32
    return %c0_i32, %c0_i32_0 : i32, i32
  }
  func.func @transform_19(%arg0: i32) -> (i32, i32) {
    %c0_i32 = arith.constant 0 : i32
    %c0_i32_0 = arith.constant 0 : i32
    %c0_i32_1 = arith.constant 0 : i32
    return %c0_i32, %c0_i32_0 : i32, i32
  }
  func.func @transform_20(%arg0: i32) -> (i32, i32) {
    %c0_i32 = arith.constant 0 : i32
    %c0_i32_0 = arith.constant 0 : i32
    %c0_i32_1 = arith.constant 0 : i32
    return %c0_i32, %c0_i32_0 : i32, i32
  }
  func.func @transform_21(%arg0: i32) -> (i32, i32) {
    %c0_i32 = arith.constant 0 : i32
    %c0_i32_0 = arith.constant 0 : i32
    %c0_i32_1 = arith.constant 0 : i32
    return %c0_i32, %c0_i32_0 : i32, i32
  }
  func.func @transform_22(%arg0: i32) -> (i32, i32) {
    %c0_i32 = arith.constant 0 : i32
    %c0_i32_0 = arith.constant 0 : i32
    %c0_i32_1 = arith.constant 0 : i32
    return %c0_i32, %c0_i32_0 : i32, i32
  }
  func.func @transform_23(%arg0: i32) -> (i32, i32) {
    %c0_i32 = arith.constant 0 : i32
    %c0_i32_0 = arith.constant 0 : i32
    %c0_i32_1 = arith.constant 0 : i32
    return %c0_i32, %c0_i32_0 : i32, i32
  }
  func.func @transform_24(%arg0: i32) -> (i32, i32) {
    %c0_i32 = arith.constant 0 : i32
    %c0_i32_0 = arith.constant 0 : i32
    %c0_i32_1 = arith.constant 0 : i32
    return %c0_i32, %c0_i32_0 : i32, i32
  }
  func.func @transform_25(%arg0: i32) -> (i32, i32, i32) {
    %c0_i32 = arith.constant 0 : i32
    %c0_i32_0 = arith.constant 0 : i32
    %c0_i32_1 = arith.constant 0 : i32
    return %arg0, %c0_i32, %c0_i32_0 : i32, i32, i32
  }
}

</mosaic_0001>

<bundles_post_ra>
// kernel: squeeze.1
= control target key start
LH: loop header
LB: loop body
LE: loop exit
PB: predicated region body
PF: predicated region fallthrough
CT: control target
= control target key end

     0   :  { %vm7_vm0 = vcmask 48128   ;;  %s49_s0 = inlined_call_operand.vmem [shape: f32[2,12], index: 0, kind: input, shape index: {}]   ;;  %s50_s1 = inlined_call_operand.vmem [shape: f32[2,2,6], index: 1, kind: output, shape index: {}]  }
   0x1   :  { %v4_v0 = vld [vmem:[%s49_s0] sm:$0x3]  ;;  %s29_s0 = smov 122  }
   0x2   :  { %5 = vst [vmem:[#allocation1] sm:$0x3] %v4_v0 }
   0x9   :  { %v9_v1 = vld [vmem:[#allocation1] sm:$0x3]  }
   0xa   :  { %v6_v2 = vld [vmem:[#allocation1] sm:$0x3]   ;;  %10 = vrot.lane.b32.xlu0 %v9_v1, %s29_s0 }
   0xb   :  { %8 = vst.msk [vmem:[#allocation0] ss:$8 sm:$0x3] %vm7_vm0, %v6_v2  }
  0x7c   :  { %v11_v3 = vpop.permute.xlu0 %10  }
  0x7d   :  { %14 = vst.msk [vmem:[#allocation0 + $0x1] ss:$8 sm:$0x3] %vm7_vm0, %v11_v3  }
  0x84   :  { %v17_v4 = vld [vmem:[#allocation0] sm:$0x3]  ;;  %v22_v5 = vld [vmem:[#allocation0 + $0x8] sm:$0x3] }
  0x85   :  { %20 = vst [vmem:[%s50_s1] sm:$0x3] %v17_v4 }
  0x86   :  { %27 = vst [vmem:[%s50_s1 + $0x2] sm:$0x3] %v22_v5 }

// kernel: _lambda_.1
= control target key start
LH: loop header
LB: loop body
LE: loop exit
PB: predicated region body
PF: predicated region fallthrough
CT: control target
= control target key end

     0   :  { %s3441_s0 = inlined_call_operand.vmem [shape: f32[2,6,16], index: 0, kind: input, shape index: {}]   ;;  %s3442_s1 = inlined_call_operand.vmem [shape: f32[2,3,16], index: 1, kind: input, shape index: {}]   ;;  %s3443_s2 = inlined_call_operand.vmem [shape: f32[2,1,16], index: 2, kind: input, shape index: {}]   ;;  %s3444_s3 = inlined_call_operand.vmem [shape: f32[16,256], index: 3, kind: input, shape index: {}]   ;;  %s3445_s4 = inlined_call_operand.vmem [shape: f32[16,256], index: 4, kind: input, shape index: {}]   ;;  %s3446_s5 = inlined_call_operand.vmem [shape: f32[256,16], index: 5, kind: input, shape index: {}]   ;;  %s3447_s6 = inlined_call_operand.vmem [shape: f32[32,6], index: 6, kind: input, shape index: {}]   ;;  %s3448_s7 = inlined_call_operand.vmem [shape: f32[32,6], index: 7, kind: input, shape index: {}]   ;;  %s3449_s8 = inlined_call_operand.vmem [shape: f32[32,1], index: 8, kind: input, shape index: {}]   ;;  %s3450_s9 = inlined_call_operand.vmem [shape: f32[32,1], index: 9, kind: input, shape index: {}]   ;;  %s3451_s10 = inlined_call_operand.vmem [shape: f32[32,32], index: 10, kind: input, shape index: {}]   ;;  %s3452_s11 = inlined_call_operand.vmem [shape: f32[32,1], index: 11, kind: input, shape index: {}]   ;;  %s3453_s12 = inlined_call_operand.vmem [shape: f32[1,32], index: 12, kind: input, shape index: {}]   ;;  %s3454_s13 = inlined_call_operand.<no memory space> [shape: f32[1,1], index: 13, kind: input, shape index: {}]   ;;  %s3455_s14 = inlined_call_operand.vmem [shape: f32[6,1], index: 14, kind: input, shape index: {}]   ;;  %s3456_s15 = inlined_call_operand.vmem [shape: f32[6,1], index: 15, kind: input, shape index: {}]   ;;  %s3457_s16 = inlined_call_operand.vmem [shape: f32[12,6], index: 16, kind: input, shape index: {}]   ;;  %s3458_s17 = inlined_call_operand.vmem [shape: f32[12,32], index: 17, kind: input, shape index: {}]   ;;  %s3459_s18 = inlined_call_operand.vmem [shape: f32[12,1], index: 18, kind: input, shape index: {}]   ;;  %s3460_s19 = inlined_call_operand.vmem [shape: f32[6,12], index: 19, kind: input, shape index: {}]   ;;  %s3461_s20 = inlined_call_operand.vmem [shape: f32[6,1], index: 20, kind: input, shape index: {}]   ;;  %s3462_s21 = inlined_call_operand.vmem [shape: f32[32,6], index: 21, kind: input, shape index: {}]   ;;  %s3463_s22 = inlined_call_operand.vmem [shape: f32[32,1], index: 22, kind: input, shape index: {}]   ;;  %s3464_s23 = inlined_call_operand.vmem [shape: f32[32,128], index: 23, kind: input, shape index: {}]   ;;  %s3465_s24 = inlined_call_operand.vmem [shape: f32[1,128], index: 24, kind: input, shape index: {}]   ;;  %s3466_s25 = inlined_call_operand.vmem [shape: f32[2,1,128], index: 25, kind: output, shape index: {}]  }
   0x1   :  { %3483 = sst [smem:[#allocation4_spill]] %s3441_s0  ;;  %v30_v0 = vstv %s3454_s13 }
   0x2   :  { %3484 = sst [smem:[#allocation5_spill]] %s3442_s1  ;;  %31 = vst [vmem:[#allocation2] sm:$0x1] %v30_v0 }
   0x3   :  { %3485 = sst [smem:[#allocation6_spill]] %s3443_s2 }
   0x4   :  { %3486 = sst [smem:[#allocation7_spill]] %s3444_s3 }
   0x5   :  { %3487 = sst [smem:[#allocation8_spill]] %s3445_s4 }
   0x6   :  { %3488 = sst [smem:[#allocation9_spill]] %s3446_s5 }
   0x7   :  { %3489 = sst [smem:[#allocation10_spill]] %s3447_s6  ;;  %s2563_s6 = smov 0  }
   0x8   :  { %3490 = sst [smem:[#allocation11_spill]] %s3448_s7 }
   0x9   :  { %3491 = sst [smem:[#allocation12_spill]] %s3449_s8 }
   0xa   :  { %3492 = sst [smem:[#allocation13_spill]] %s3450_s9 }
   0xb LB: > { %3493 = sst [smem:[#allocation3_spill]] %s2426_s6  ;;  %s2238_s30 = sadd.s32 4294967295, %s2426_s6   ;;  %s2426_s6 = sphi %s2563_s6, %s37_s6  }
   0xc   : > { %p2242_p0 = scmp.ge.s32.totalorder %s2426_s6, 1  ;;  %p705_p1 = scmp.lt.s32.totalorder %s2426_s6, 3 }
   0xe   : > { %p706_p2 = pnand %p2242_p0, %p705_p1 }
   0xf   : > { %s3494_s26 = sld [smem:[#allocation13_spill]] (!%p706_p2)  ;;  %p777_p3 = scmp.lt.s32.totalorder (!%p706_p2), %s2238_s30, 1 }
  0x10   : > { %709 = sbr.rel (%p706_p2) target bundleno = 1616 (0x650), region = 120  ;;  %s3495_s8 = sld [smem:[#allocation7_spill]] (!%p706_p2) }
  0x11   : > { %s3496_s28 = sld [smem:[#allocation8_spill]] (!%p706_p2) }
  0x12   : > { %s3497_s7 = sld [smem:[#allocation6_spill]] (!%p706_p2) }
  0x13   : > { %s3498_s4 = sld [smem:[#allocation5_spill]] (!%p706_p2) }
  0x14   : > { %s3499_s29 = sld [smem:[#allocation4_spill]] (!%p706_p2) }
  0x15   : > { %v996_v1 = vld [vmem:[%s3494_s26] sm:$0xff]  ;;  %v2428_v4 = vmov 0   ;;  %s3559_s30 = smov (!%p777_p3, %s2238_s30), 1  ;;  %vm838_vm0 = vcmask 130048   ;;  %v998_v14 = vld [vmem:[%s3494_s26 + $0x10] sm:$0xff]  ;;  %v997_v18 = vld [vmem:[%s3494_s26 + $0x8] sm:$0xff] }
  0x16   : > { %v2577_v2 = vld [vmem:[%s3495_s8 + $0x10] sm:$0xff]  ;;  %2331 = vset.pattern.permute.xlu0 %v2428_v4  ;;  %v794_v6 = vld [vmem:[%s3495_s8] sm:$0xff]  ;;  %v797_v8 = vld [vmem:[%s3495_s8 + $0x18] sm:$0xff]  ;;  %2332 = vset.pattern.permute.xlu1 %v2428_v4  ;;  %s2244_s13 = sshll.u32 %s3559_s30, 2  ;;  %vm3479_vm1 = vcmask 1045504   ;;  %vm3478_vm2 = vcmask 48128  }
  0x17   : > { %v800_v3 = vld [vmem:[%s3496_s28 + $0x10] sm:$0xff]  ;;  %916 = vmatpush.msra.mxu2 %v2577_v2  ;;  %v798_v7 = vld [vmem:[%s3496_s28] sm:$0xff]  ;;  %1022 = vperm.xlu0 %2331, %v996_v1   ;;  %v801_v10 = vld [vmem:[%s3496_s28 + $0x18] sm:$0xff]  ;;  %s3501_s5 = sld [smem:[#allocation12_spill]]  ;;  %vm884_vm3 = vcmask 1042432  }
  0x18   : > { %v836_v5 = vsub.f32 %v2577_v2, %v800_v3  ;;  %v834_v9 = vsub.f32 %v794_v6, %v798_v7  ;;  %v795_v11 = vld [vmem:[%s3495_s8 + $0x8] sm:$0xff]  ;;  %v837_v12 = vsub.f32 %v797_v8, %v801_v10  ;;  %s2611_s3 = scalar_lea.vmem %s3497_s7, %s3559_s30  ;;  %1032 = vperm.xlu1 %2332, %v998_v14   ;;  %s2243_s8 = sshll.u32 %s3559_s30, 3  ;;  %v999_v20 = vld [vmem:[%s3494_s26 + $0x18] sm:$0xff]  ;;  %2333 = vset.pattern.permute.xlu2 %v2428_v4  ;;  %v1006_v28 = vld [vmem:[%s3452_s11 + $0x10] sm:$0xff] }
  0x19   : > { %917 = vmatpush.msra.mxu2 %v794_v6  ;;  %v799_v13 = vld [vmem:[%s3496_s28 + $0x8] sm:$0xff]  ;;  %v793_v16 = vld [vmem:[%s2611_s3] sm:$0x1]  ;;  %s784_s9 = scalar_lea.vmem %s3498_s4, %s2244_s13  ;;  %s3500_s4 = sld [smem:[#allocation11_spill]]  ;;  %v1007_v32 = vld [vmem:[%s3452_s11 + $0x18] sm:$0xff] }
  0x1a   : > { %856 = vmatpush.msra.mxu0 %v836_v5  ;;  %v835_v15 = vsub.f32 %v795_v11, %v799_v13  ;;  %876 = vmatpush.msra.mxu1 %v837_v12  ;;  %v792_v17 = vld [vmem:[%s784_s9] sm:$0x7]  ;;  %s2623_s2 = scalar_lea.vmem %s3499_s29, %s2243_s8  ;;  %s3502_s9 = sld [smem:[#allocation10_spill]]  ;;  %v1005_v29 = vld [vmem:[%s3452_s11 + $0x8] sm:$0xff] }
  0x1b   : > { %936 = vmatpush.msrb.mxu2 %v797_v8  ;;  %v2630_v19 = vld [vmem:[%s2623_s2] sm:$0x3f]  ;;  %v1017_v38 = vld [vmem:[%s3459_s18 + $0x8] sm:$0xf]  ;;  %s3547_s7 = sld [smem:[#allocation9_spill]] }
  0x1c   : > { %857 = vmatpush.msra.mxu0 %v834_v9  ;;  %2247 = vmatmul.msk.f32.vlgmr.msra.gmra.mxu2 %vm838_vm0, %v793_v16  ;;  %v1009_v33 = vld [vmem:[#allocation2] sm:$0x1] }
  0x1d   : > { %2245 = vmatmul.msk.f32.vlgmr.msra.gmra.mxu0 %vm838_vm0, %v792_v17  ;;  %877 = vmatpush.msra.mxu1 %v835_v15  ;;  %v995_v22 = vld [vmem:[%s3501_s5 + $0x18] sm:$0xff]  ;;  %v993_v23 = vld [vmem:[%s3501_s5 + $0x8] sm:$0xff]  ;;  %v992_v24 = vld [vmem:[%s3501_s5] sm:$0xff] }
  0x1e   : > { %956 = vmatpush.msrb.mxu0 %v800_v3  ;;  %2246 = vmatmul.msk.f32.vlgmr.msra.gmra.mxu1 %vm838_vm0, %v792_v17  ;;  %v994_v27 = vld [vmem:[%s3501_s5 + $0x10] sm:$0xff]  ;;  %v1010_v34 = vld [vmem:[%s3455_s14] sm:$0x3f] }
  0x1f   : > { %937 = vmatpush.msrb.mxu2 %v795_v11  ;;  %976 = vmatpush.msrb.mxu1 %v801_v10  ;;  %v988_v21 = vld [vmem:[%s3500_s4] sm:$0xff]  ;;  %v989_v25 = vld [vmem:[%s3500_s4 + $0x8] sm:$0xff]  ;;  %v990_v30 = vld [vmem:[%s3500_s4 + $0x10] sm:$0xff] }
  0x20   : > { %957 = vmatpush.msrb.mxu0 %v798_v7  ;;  %1027 = vperm.xlu0 %2331, %v997_v18   ;;  %v984_v26 = vld [vmem:[%s3502_s9] sm:$0xff]  ;;  %v985_v31 = vld [vmem:[%s3502_s9 + $0x8] sm:$0xff]  ;;  %v991_v35 = vld [vmem:[%s3500_s4 + $0x18] sm:$0xff] }
  0x21   : > { %2251 = vmatpush.msk.msra.mxu2 %vm3479_vm1, %v2630_v19  ;;  %977 = vmatpush.msrb.mxu1 %v799_v13  ;;  %v986_v36 = vld [vmem:[%s3502_s9 + $0x10] sm:$0xff]  ;;  %v1004_v37 = vld [vmem:[%s3452_s11] sm:$0xff]  ;;  %v987_v40 = vld [vmem:[%s3502_s9 + $0x18] sm:$0xff] }
  0x22   : > { %2256 = vmatpush.msk.msra.mxu3 %vm3479_vm1, %v2630_v19  ;;  %1037 = vperm.xlu1 %2332, %v999_v20   ;;  %v1016_v39 = vld [vmem:[%s3459_s18] sm:$0xff] }
  0x23   : > { %2257 = vmatmul.msk.f32.vlgmr.msra.gmra.mxu3 %vm3478_vm2, %v988_v21  ;;  %1153 = vmatpush.msra.mxu0 %v800_v3  ;;  %v1011_v41 = vld [vmem:[%s3456_s15] sm:$0x3f] }
  0x24   : > { %1252 = vmatpush.msrb.mxu3 %v797_v8  ;;  %2248 = vmatmul.msk.f32.vlgmr.msrb.gmra.mxu2 %vm838_vm0, %v793_v16  ;;  %v1019_v45 = vld [vmem:[%s3461_s20] sm:$0x3f] }
  0x25   : > { %2249 = vmatmul.msk.f32.vlgmr.msrb.gmra.mxu0 %vm838_vm0, %v793_v16  ;;  %1284 = vperm.xlu2 %2333, %v995_v22  }
  0x26   : > { %2250 = vmatmul.msk.f32.vlgmr.msrb.gmra.mxu1 %vm838_vm0, %v793_v16  ;;  %1223 = vmatpush.msrb.mxu2 %v2577_v2 }
  0x27   : > { %1253 = vmatpush.msrb.mxu3 %v795_v11  ;;  %1182 = vmatpush.msra.mxu1 %v801_v10 }
  0x28   : > { %1274 = vperm.xlu0 %2331, %v993_v23   ;;  %1224 = vmatpush.msrb.mxu2 %v794_v6 }
  0x29   : > { %1154 = vmatpush.msra.mxu0 %v798_v7  ;;  %1183 = vmatpush.msra.mxu1 %v799_v13 }
  0x2a   : > { %1269 = vperm.xlu1 %2332, %v992_v24  }
  0x2b   : > { %2258 = vmatmul.msk.f32.gmra.mxu3 %vm3478_vm2, %v989_v25 }
  0x2c   : > { %2252 = vmatmul.msk.f32.vlgmr.msra.gmra.mxu2 %vm3478_vm2, %v984_v26 }
  0x2d   : > { %1279 = vperm.xlu2 %2333, %v994_v27  }
  0x30   : > { %1475 = vperm.xlu0 %2331, %v1006_v28  }
  0x32   : > { %1470 = vperm.xlu1 %2332, %v1005_v29  }
  0x33   : > { %2259 = vmatmul.msk.f32.gmra.mxu3 %vm3478_vm2, %v990_v30 }
  0x34   : > { %2253 = vmatmul.msk.f32.gmra.mxu2 %vm3478_vm2, %v985_v31 }
  0x35   : > { %1480 = vperm.xlu2 %2333, %v1007_v32  }
  0x38   : > { %1716 = vperm.xlu0 %2331, %v1009_v33  }
  0x3a   : > { %1911 = vperm.xlu1 %2332, %v1010_v34  }
  0x3b   : > { %2260 = vmatmul.msk.f32.gmra.mxu3 %vm3478_vm2, %v991_v35 }
  0x3c   : > { %2254 = vmatmul.msk.f32.gmra.mxu2 %vm3478_vm2, %v986_v36 }
  0x3d   : > { %1465 = vperm.xlu2 %2333, %v1004_v37  }
  0x40   : > { %1989 = vperm.xlu0 %2331, %v1017_v38  }
  0x42   : > { %1984 = vperm.xlu1 %2332, %v1016_v39  }
  0x44   : > { %2255 = vmatmul.msk.f32.gmra.mxu2 %vm3478_vm2, %v987_v40 }
  0x45   : > { %1917 = vperm.xlu2 %2333, %v1011_v41  }
  0x4d   : > { %2036 = vperm.xlu2 %2333, %v1019_v45  }
  0x7f   : > { %v1285_v29 = vpop.permute.xlu2 %1284 }
  0x89   : > { %v1023_v46 = vpop.permute.xlu0 %1022 }
  0x8a   : > { %v1033_v54 = vpop.permute.xlu1 %1032 }
  0x92   : > { %v1028_v51 = vpop.permute.xlu0 %1027 }
  0x94   : > { %v1038_v58 = vpop.permute.xlu1 %1037 }
  0x9a   : > { %v859_v61 = vpop.f32.mrf.mxu0  ;;  %v1275_v32 = vpop.permute.xlu0 %1274 }
  0x9b   : > { %v882_v62 = vmul.f32 %v859_v61, %v859_v61  ;;  %v879_v63 = vpop.f32.mrf.mxu1 }
  0x9c   : > { %v883_v1 = vmul.f32 %v879_v63, %v879_v63  ;;  %v1270_v18 = vpop.permute.xlu1 %1269 }
  0x9d   : > { %v885_v0 = vsel %vm884_vm3, %v882_v62, 0.0 }
  0x9e   : > { %v886_v2 = vrot.slane %v885_v0, 4  ;;  %v892_v3 = vsel %vm884_vm3, %v883_v1, 0.0 }
  0x9f   : > { %v2712_v42 = vpop.f32.mrf.mxu2  ;;  %v893_v5 = vrot.slane %v892_v3, 4 }
  0xa0   : > { %v887_v4 = vadd.f32 %v886_v2, %v885_v0 }
  0xa1   : > { %v894_v9 = vadd.f32 %v893_v5, %v892_v3 }
  0xa2   : > { %v2735_v6 = vpop.f32.mrf.mxu0  ;;  %v888_v8 = vrot.slane %v887_v4, 2 }
  0xa3   : > { %v2737_v7 = vpop.f32.mrf.mxu1  ;;  %v895_v11 = vrot.slane %v894_v9, 2 }
  0xa4   : > { %v889_v10 = vadd.f32 %v888_v8, %v887_v4 }
  0xa5   : > { %v896_v15 = vadd.f32 %v895_v11, %v894_v9 }
  0xa6   : > { %v1115_v43 = vpop.f32.mrf.mxu3  ;;  %v890_v14 = vrot.slane %v889_v10, 1 }
  0xa7   : > { %2261 = vmatmul.msk.f32.vlgmr.msra.gmra.mxu0 %vm838_vm0, %v1115_v43  ;;  %2265 = vmatmul.msk.f32.vlgmr.msra.gmra.mxu1 %vm838_vm0, %v1115_v43  ;;  %v2716_v44 = vpop.f32.mrf.mxu2  ;;  %v897_v17 = vrot.slane %v896_v15, 1 }
  0xa8   : > { %v891_v16 = vadd.f32 %v890_v14, %v889_v10 }
  0xa9   : > { %v898_v26 = vadd.f32 %v897_v17, %v896_v15 }
  0xaa   : > { %v1287_v22 = vmul.f32 %v1270_v18, %v891_v16  ;;  %v1289_v37 = vmul.f32 %v1275_v32, %v891_v16  ;;  %v1293_v3 = vmul.f32 %v1285_v29, %v891_v16 }
  0xab   : > { %v1288_v30 = vmul.f32 %v1270_v18, %v898_v26  ;;  %v1290_v39 = vmul.f32 %v1275_v32, %v898_v26  ;;  %v1294_v4 = vmul.f32 %v1285_v29, %v898_v26 }
  0xae   : > { %v1118_v47 = vpop.f32.mrf.mxu3 }
  0xaf   : > { %2262 = vmatmul.msk.f32.gmra.mxu0 %vm838_vm0, %v1118_v47  ;;  %2266 = vmatmul.msk.f32.gmra.mxu1 %vm838_vm0, %v1118_v47  ;;  %v1074_v48 = vpop.f32.mrf.mxu2 }
  0xb0   : > { %v1075_v49 = vadd.f32 %v1074_v48, %v1023_v46 }
  0xb2   : > { %2269 = vmatmul.msk.f32.vlgmr.msrb.gmra.mxu2 %vm838_vm0, %v1075_v49  ;;  %2273 = vmatmul.msk.f32.vlgmr.msrb.gmra.mxu3 %vm838_vm0, %v1075_v49 }
  0xb6   : > { %v1121_v50 = vpop.f32.mrf.mxu3 }
  0xb7   : > { %2263 = vmatmul.msk.f32.gmra.mxu0 %vm838_vm0, %v1121_v50  ;;  %2267 = vmatmul.msk.f32.gmra.mxu1 %vm838_vm0, %v1121_v50  ;;  %v1077_v52 = vpop.f32.mrf.mxu2  ;;  %v1280_v50 = vpop.permute.xlu2 %1279 }
  0xb8   : > { %v1078_v53 = vadd.f32 %v1077_v52, %v1028_v51  ;;  %v1291_v51 = vmul.f32 %v1280_v50, %v891_v16 }
  0xba   : > { %2270 = vmatmul.msk.f32.gmra.mxu2 %vm838_vm0, %v1078_v53  ;;  %2274 = vmatmul.msk.f32.gmra.mxu3 %vm838_vm0, %v1078_v53 }
  0xbe   : > { %v1124_v55 = vpop.f32.mrf.mxu3 }
  0xbf   : > { %2264 = vmatmul.msk.f32.gmra.mxu0 %vm838_vm0, %v1124_v55  ;;  %2268 = vmatmul.msk.f32.gmra.mxu1 %vm838_vm0, %v1124_v55  ;;  %v1080_v56 = vpop.f32.mrf.mxu2 }
  0xc0   : > { %v1081_v57 = vadd.f32 %v1080_v56, %v1033_v54  ;;  %v1292_v54 = vmul.f32 %v1280_v50, %v898_v26 }
  0xc2   : > { %2271 = vmatmul.msk.f32.gmra.mxu2 %vm838_vm0, %v1081_v57  ;;  %2275 = vmatmul.msk.f32.gmra.mxu3 %vm838_vm0, %v1081_v57 }
  0xc7   : > { %v1083_v59 = vpop.f32.mrf.mxu2 }
  0xc8   : > { %v1084_v60 = vadd.f32 %v1083_v59, %v1038_v58 }
  0xca   : > { %2272 = vmatmul.msk.f32.gmra.mxu2 %vm838_vm0, %v1084_v60  ;;  %2276 = vmatmul.msk.f32.gmra.mxu3 %vm838_vm0, %v1084_v60 }
 0x124   : > { %v1156_v12 = vpop.f32.mrf.mxu0  ;;  %v1185_v13 = vpop.f32.mrf.mxu1 }
 0x12c   : > { %v1159_v24 = vpop.f32.mrf.mxu0  ;;  %v1188_v25 = vpop.f32.mrf.mxu1 }
 0x134   : > { %v1162_v45 = vpop.f32.mrf.mxu0  ;;  %v1191_v46 = vpop.f32.mrf.mxu1 }
 0x135   : > { %v1226_v20 = vpop.f32.mrf.mxu2  ;;  %v1255_v21 = vpop.f32.mrf.mxu3 }
 0x136   : > { %v1227_v23 = vadd.f32 %v1226_v20, %v1156_v12  ;;  %v1256_v28 = vadd.f32 %v1255_v21, %v1185_v13 }
 0x138   : > { %v2739_v27 = vadd.f32 %v1287_v22, %v1227_v23  ;;  %v2742_v33 = vadd.f32 %v1288_v30, %v1256_v28 }
 0x13a   : > { %v2277_v31 = vmul.f32 -1.442695, %v2739_v27  ;;  %v2278_v40 = vmul.f32 -1.442695, %v2742_v33 }
 0x13c   : > { %2335 = vpow2.f32 %v2277_v31  ;;  %v1165_v0 = vpop.f32.mrf.mxu0  ;;  %v1194_v1 = vpop.f32.mrf.mxu1 }
 0x13d   : > { %v1229_v34 = vpop.f32.mrf.mxu2  ;;  %v1258_v35 = vpop.f32.mrf.mxu3  ;;  %2337 = vpow2.f32 %v2278_v40 }
 0x13e   : > { %v1230_v36 = vadd.f32 %v1229_v34, %v1159_v24  ;;  %v1259_v38 = vadd.f32 %v1258_v35, %v1188_v25 }
 0x140   : > { %v2745_v41 = vadd.f32 %v1289_v37, %v1230_v36  ;;  %v2747_v43 = vadd.f32 %v1290_v39, %v1259_v38 }
 0x142   : > { %v2279_v47 = vmul.f32 -1.442695, %v2745_v41  ;;  %v2336_v48 = vpop.eup %2335  ;;  %v2280_v49 = vmul.f32 -1.442695, %v2747_v43 }
 0x143   : > { %v2751_v55 = vadd.f32 1.0, %v2336_v48  ;;  %v2338_v60 = vpop.eup %2337 }
 0x144   : > { %2339 = vpow2.f32 %v2279_v47  ;;  %v2760_v5 = vadd.f32 1.0, %v2338_v60 }
 0x145   : > { %v1232_v52 = vpop.f32.mrf.mxu2  ;;  %v1261_v53 = vpop.f32.mrf.mxu3  ;;  %2341 = vpow2.f32 %v2280_v49  ;;  %v1346_v30 = vand.u32 2147483648, %v2751_v55  ;;  %vm1340_vm4 = vweird.f32 %v2751_v55 }
 0x146   : > { %v1233_v56 = vadd.f32 %v1232_v52, %v1162_v45  ;;  %v1262_v57 = vadd.f32 %v1261_v53, %v1191_v46  ;;  %2343 = vrcp.f32 %v2751_v55  ;;  %v1344_v46 = vand.u32 2147483647, %v2751_v55 }
 0x147   : > { %v2809_v47 = vor.u32 1.1754944e-38, %v1346_v30  ;;  %v1361_v60 = vand.u32 2147483648, %v2760_v5 }
 0x148   : > { %v2753_v58 = vadd.f32 %v1291_v51, %v1233_v56  ;;  %v2755_v59 = vadd.f32 %v1292_v54, %v1262_v57  ;;  %v1359_v51 = vand.u32 2147483647, %v2760_v5 }
 0x14a   : > { %v2281_v61 = vmul.f32 -1.442695, %v2753_v58  ;;  %v2282_v62 = vmul.f32 -1.442695, %v2755_v59  ;;  %v2340_v63 = vpop.eup %2339 }
 0x14b   : > { %v2342_v2 = vpop.eup %2341  ;;  %v2762_v10 = vadd.f32 1.0, %v2340_v63 }
 0x14c   : > { %2345 = vpow2.f32 %v2281_v61  ;;  %v2764_v13 = vadd.f32 1.0, %v2342_v2  ;;  %v2766_v14 = vpop.eup %2343 }
 0x14d   : > { %v1235_v8 = vpop.f32.mrf.mxu2  ;;  %v1264_v9 = vpop.f32.mrf.mxu3  ;;  %2347 = vpow2.f32 %v2282_v62  ;;  %v1336_v22 = vmul.f32 %v2766_v14, %v2751_v55  ;;  %v1376_v45 = vand.u32 2147483648, %v2762_v10  ;;  %vm1341_vm5 = vweird.f32 %v2766_v14 }
 0x14e   : > { %v1236_v11 = vadd.f32 %v1235_v8, %v1165_v0  ;;  %v1265_v12 = vadd.f32 %v1264_v9, %v1194_v1  ;;  %2349 = vrcp.f32 %v2760_v5  ;;  %vm1370_vm6 = vweird.f32 %v2762_v10  ;;  %vm2838_vm8 = vmor %vm1340_vm4, %vm1341_vm5 }
 0x14f   : > { %2351 = vrcp.f32 %v2762_v10  ;;  %v1337_v26 = vsub.f32 1.0, %v1336_v22  ;;  %v1374_v63 = vand.u32 2147483647, %v2762_v10  ;;  %v2828_v0 = vor.u32 1.1754944e-38, %v1376_v45 }
 0x150   : > { %v2768_v15 = vadd.f32 %v1293_v3, %v1236_v11  ;;  %v2770_v17 = vadd.f32 %v1294_v4, %v1265_v12  ;;  %2353 = vrcp.f32 %v2764_v13  ;;  %v1389_v2 = vand.u32 2147483647, %v2764_v13 }
 0x151   : > { %v1338_v35 = vmul.f32 %v2766_v14, %v1337_v26  ;;  %v1391_v3 = vand.u32 2147483648, %v2764_v13  ;;  %vm2863_vm15 = vcmp.eq.f32.partialorder %v1374_v63, 8.507059e+37  ;;  %vm2874_vm5 = vcmp.eq.f32.partialorder %v1344_v46, 8.507059e+37 }
 0x152   : > { %v2346_v16 = vpop.eup %2345  ;;  %v2283_v18 = vmul.f32 -1.442695, %v2768_v15  ;;  %v2284_v20 = vmul.f32 -1.442695, %v2770_v17 }
 0x153   : > { %v2777_v21 = vadd.f32 1.0, %v2346_v16  ;;  %v2348_v23 = vpop.eup %2347  ;;  %v2819_v53 = vadd.f32 %v2766_v14, %v1338_v35 }
 0x154   : > { %2355 = vpow2.f32 %v2283_v18  ;;  %v2782_v24 = vadd.f32 1.0, %v2348_v23  ;;  %v2784_v25 = vpop.eup %2349 }
 0x155   : > { %2357 = vrcp.f32 %v2777_v21  ;;  %v2787_v28 = vpop.eup %2351  ;;  %v1351_v36 = vmul.f32 %v2784_v25, %v2760_v5  ;;  %v1404_v56 = vand.u32 2147483647, %v2777_v21  ;;  %v1406_v61 = vand.u32 2147483648, %v2777_v21 }
 0x156   : > { %2359 = vpow2.f32 %v2284_v20  ;;  %v2789_v29 = vpop.eup %2353  ;;  %v1366_v39 = vmul.f32 %v2787_v28, %v2762_v10  ;;  %vm1371_vm7 = vweird.f32 %v2787_v28  ;;  %vm1400_vm9 = vweird.f32 %v2777_v21 }
 0x157   : > { %2361 = vrcp.f32 %v2782_v24  ;;  %v1381_v52 = vmul.f32 %v2789_v29, %v2764_v13  ;;  %v1352_v54 = vsub.f32 1.0, %v1351_v36  ;;  %v1343_v11 = vsel %vm2838_vm8, %v2766_v14, %v2819_v53 }
 0x158   : > { %v1367_v57 = vsub.f32 1.0, %v1366_v39  ;;  %vm2849_vm10 = vcmp.eq.f32.partialorder %v1404_v56, 8.507059e+37  ;;  %vm1415_vm11 = vweird.f32 %v2782_v24  ;;  %v1407_v20 = vor.u32 1.1754944e-38, %v1406_v61 }
 0x159   : > { %v1382_v9 = vsub.f32 1.0, %v1381_v52  ;;  %v1353_v12 = vmul.f32 %v2784_v25, %v1352_v54  ;;  %v1419_v23 = vand.u32 2147483647, %v2782_v24  ;;  %v1421_v26 = vand.u32 2147483648, %v2782_v24 }
 0x15a   : > { %v2356_v31 = vpop.eup %2355  ;;  %v1368_v55 = vmul.f32 %v2787_v28, %v1367_v57  ;;  %vm3481_vm8 = vcmask 261120  }
 0x15b   : > { %v2792_v32 = vpop.eup %2357  ;;  %v2794_v34 = vadd.f32 1.0, %v2356_v31  ;;  %v1383_v39 = vmul.f32 %v2789_v29, %v1382_v9  ;;  %v1354_v45 = vadd.f32 %v2784_v25, %v1353_v12 }
 0x15c   : > { %v2360_v37 = vpop.eup %2359  ;;  %v1396_v38 = vmul.f32 %v2792_v32, %v2777_v21  ;;  %vm1401_vm14 = vweird.f32 %v2792_v32  ;;  %v1369_v52 = vadd.f32 %v2787_v28, %v1368_v55 }
 0x15d   : > { %v2804_v40 = vpop.eup %2361  ;;  %2363 = vrcp.f32 %v2794_v34  ;;  %v2811_v48 = vadd.f32 1.0, %v2360_v37  ;;  %v1436_v35 = vand.u32 2147483648, %v2794_v34  ;;  %vm1430_vm2 = vweird.f32 %v2794_v34  ;;  %vm2881_vm1 = vmor %vm1400_vm9, %vm1401_vm14 }
 0x15e   : > { %v1397_v49 = vsub.f32 1.0, %v1396_v38  ;;  %v1411_v50 = vmul.f32 %v2804_v40, %v2782_v24  ;;  %vm1416_vm3 = vweird.f32 %v2804_v40  ;;  %vm2895_vm9 = vmor %vm1370_vm6, %vm1371_vm7  ;;  %v1384_v12 = vadd.f32 %v2789_v29, %v1383_v39 }
 0x15f   : > { %2365 = vrcp.f32 %v2811_v48  ;;  %v1437_v63 = vor.u32 1.1754944e-38, %v1436_v35  ;;  %v1451_v46 = vand.u32 2147483648, %v2811_v48  ;;  %v1449_v9 = vand.u32 2147483647, %v2811_v48 }
 0x160   : > { %v1412_v62 = vsub.f32 1.0, %v1411_v50  ;;  %v1398_v1 = vmul.f32 %v2792_v32, %v1397_v49  ;;  %v1434_v50 = vand.u32 2147483647, %v2794_v34  ;;  %vm1445_vm0 = vweird.f32 %v2811_v48 }
 0x161   : > { %v1373_v10 = vsel %vm2895_vm9, %v2787_v28, %v1369_v52  ;;  %vm3518_vm6 = vweird.f32 %v2764_v13  ;;  %v1452_v28 = vor.u32 1.1754944e-38, %v1451_v46  ;;  %v1422_v35 = vor.u32 1.1754944e-38, %v1421_v26 }
 0x162   : > { %v1413_v22 = vmul.f32 %v2804_v40, %v1412_v62  ;;  %v1399_v36 = vadd.f32 %v2792_v32, %v1398_v1  ;;  %vm1435_vm12 = vcmp.eq.f32.partialorder %v1434_v50, 8.507059e+37 }
 0x163   : > { %v2364_v8 = vpop.eup %2363 }
 0x164   : > { %v1426_v16 = vmul.f32 %v2364_v8, %v2794_v34  ;;  %vm1431_vm4 = vweird.f32 %v2364_v8  ;;  %v1414_v61 = vadd.f32 %v2804_v40, %v1413_v22  ;;  %v1403_v1 = vsel %vm2881_vm1, %v2792_v32, %v1399_v36  ;;  %vm2904_vm1 = vmor %vm1415_vm11, %vm1416_vm3 }
 0x165   : > { %v2366_v30 = vpop.eup %2365  ;;  %vm1432_vm14 = vmor %vm1430_vm2, %vm1431_vm4  ;;  %vm3517_vm2 = vweird.f32 %v2789_v29  ;;  %vm1360_vm4 = vcmp.eq.f32.partialorder %v1359_v51, 8.507059e+37 }
 0x166   : > { %v1427_v31 = vsub.f32 1.0, %v1426_v16  ;;  %v1441_v38 = vmul.f32 %v2366_v30, %v2811_v48  ;;  %vm1446_vm13 = vweird.f32 %v2366_v30  ;;  %vm2920_vm7 = vmor %vm3518_vm6, %vm3517_vm2 }
 0x167   : > { %vm1447_vm11 = vmor %vm1445_vm0, %vm1446_vm13  ;;  %vm3521_vm13 = vweird.f32 %v2784_v25  ;;  %vm3522_vm0 = vweird.f32 %v2760_v5 }
 0x168   : > { %v1428_v49 = vmul.f32 %v2364_v8, %v1427_v31  ;;  %v1442_v56 = vsub.f32 1.0, %v1441_v38  ;;  %v1408_v31 = vsel %vm2849_vm10, %v1407_v20, %v1403_v1  ;;  %vm1450_vm10 = vcmp.eq.f32.partialorder %v1449_v9, 8.507059e+37  ;;  %vm1357_vm3 = vmor %vm3522_vm0, %vm3521_vm13 }
 0x169   : > { %v1388_v20 = vsel %vm2920_vm7, %v2789_v29, %v1384_v12  ;;  %v1459_v38 = vmul.f32 %v1408_v31, %v2753_v58  ;;  %v1348_v58 = vsel %vm2874_vm5, %v2809_v47, %v1343_v11  ;;  %v1358_v29 = vsel %vm1357_vm3, %v2784_v25, %v1354_v45  ;;  %v1000_v25 = vld [vmem:[%s3451_s10] sm:$0xff] }
 0x16a   : > { %v1429_v62 = vadd.f32 %v2364_v8, %v1428_v49  ;;  %v1443_v34 = vmul.f32 %v2366_v30, %v1442_v56  ;;  %v1455_v14 = vmul.f32 %v1348_v58, %v2739_v27  ;;  %v1001_v27 = vld [vmem:[%s3451_s10 + $0x8] sm:$0xff]  ;;  %vm3480_vm5 = vcmask 128000  }
 0x16b   : > { %v1872_v5 = vsel %vm3480_vm5, %v2630_v19, 0.0 }
 0x16c   : > { %v1433_v16 = vsel %vm1432_vm14, %v2364_v8, %v1429_v62  ;;  %v1444_v22 = vadd.f32 %v2366_v30, %v1443_v34  ;;  %v1418_v8 = vsel %vm2904_vm1, %v2804_v40, %v1414_v61  ;;  %v1378_v40 = vsel %vm2863_vm15, %v2828_v0, %v1373_v10  ;;  %v1481_v34 = vpop.permute.xlu2 %1480 }
 0x16d   : > { %v1438_v55 = vsel %vm1435_vm12, %v1437_v63, %v1433_v16  ;;  %vm1420_vm12 = vcmp.eq.f32.partialorder %v1419_v23, 8.507059e+37  ;;  %vm1390_vm15 = vcmp.eq.f32.partialorder %v1389_v2, 8.507059e+37  ;;  %v1457_v0 = vmul.f32 %v1378_v40, %v2745_v41 }
 0x16e   : > { %v1461_v48 = vmul.f32 %v1438_v55, %v2768_v15  ;;  %v1448_v18 = vsel %vm1447_vm11, %v2366_v30, %v1444_v22  ;;  %v1423_v39 = vsel %vm1420_vm12, %v1422_v35, %v1418_v8  ;;  %v1392_v15 = vor.u32 1.1754944e-38, %v1391_v3 }
 0x16f   : > { %v1453_v36 = vsel %vm1450_vm10, %v1452_v28, %v1448_v18  ;;  %v1460_v13 = vmul.f32 %v1423_v39, %v2755_v59  ;;  %v2429_v59 = vmov 6.0   ;;  %v1873_v51 = vrot.slane %v1872_v5, 4 }
 0x170   : > { %1508 = vmatpush.msrb.mxu0 %v1461_v48  ;;  %v1462_v23 = vmul.f32 %v1453_v36, %v2770_v17  ;;  %v1393_v3 = vsel %vm1390_vm15, %v1392_v15, %v1388_v20  ;;  %v1362_v17 = vor.u32 1.1754944e-38, %v1361_v60  ;;  %2367 = vrcp.f32 %v2429_v59 }
 0x171   : > { %v1458_v41 = vmul.f32 %v1393_v3, %v2747_v43  ;;  %v1002_v43 = vld [vmem:[%s3451_s10 + $0x10] sm:$0xff]  ;;  %v1874_v2 = vadd.f32 %v1873_v51, %v1872_v5 }
 0x172   : > { %1509 = vmatpush.msrb.mxu0 %v1459_v38  ;;  %1537 = vmatpush.msrb.mxu1 %v1462_v23  ;;  %v1363_v53 = vsel %vm1360_vm4, %v1362_v17, %v1358_v29  ;;  %v1476_v38 = vpop.permute.xlu0 %1475 }
 0x173   : > { %v1456_v47 = vmul.f32 %v1363_v53, %v2742_v33  ;;  %v1003_v33 = vld [vmem:[%s3451_s10 + $0x18] sm:$0xff]  ;;  %v1875_v11 = vrot.slane %v1874_v2, 2 }
 0x174   : > { %1510 = vmatpush.msrb.mxu0 %v1457_v0  ;;  %1538 = vmatpush.msrb.mxu1 %v1460_v13  ;;  %v1466_v10 = vpop.permute.xlu2 %1465 }
 0x175   : > { %v1876_v30 = vadd.f32 %v1875_v11, %v1874_v2 }
 0x176   : > { %1511 = vmatpush.msrb.mxu0 %v1455_v14  ;;  %1539 = vmatpush.msrb.mxu1 %v1458_v41  ;;  %v2368_v60 = vpop.eup %2367 }
 0x177   : > { %2285 = vmatmul.msk.f32.vlgmr.msrb.gmra.mxu0 %vm3481_vm8, %v1000_v25  ;;  %v1880_v4 = vmul.f32 6.0, %v2368_v60  ;;  %v1877_v45 = vrot.slane %v1876_v30, 1  ;;  %vm1884_vm9 = vweird.f32 %v2368_v60 }
 0x178   : > { %1540 = vmatpush.msrb.mxu1 %v1456_v47 }
 0x179   : > { %2289 = vmatmul.msk.f32.vlgmr.msrb.gmra.mxu1 %vm3481_vm8, %v1000_v25  ;;  %v1881_v26 = vsub.f32 1.0, %v1880_v4  ;;  %v1878_v50 = vadd.f32 %v1877_v45, %v1876_v30 }
 0x17b   : > { %v1882_v37 = vmul.f32 %v2368_v60, %v1881_v26 }
 0x17d   : > { %v1883_v49 = vadd.f32 %v2368_v60, %v1882_v37 }
 0x17f   : > { %2286 = vmatmul.msk.f32.gmra.mxu0 %vm3481_vm8, %v1001_v27  ;;  %v1885_v52 = vsel %vm1884_vm9, %v2368_v60, %v1883_v49 }
 0x180   : > { %v1886_v54 = vmul.f32 %v1885_v52, %v1878_v50 }
 0x181   : > { %2290 = vmatmul.msk.f32.gmra.mxu1 %vm3481_vm8, %v1001_v27 }
 0x182   : > { %v2982_v56 = vsub.f32 %v2630_v19, %v1886_v54  ;;  %v1471_v19 = vpop.permute.xlu1 %1470 }
 0x184   : > { %v1888_v57 = vmul.f32 %v2982_v56, %v2982_v56 }
 0x186   : > { %v1889_v61 = vsel %vm3480_vm5, %v1888_v57, 0.0 }
 0x187   : > { %2287 = vmatmul.msk.f32.gmra.mxu0 %vm3481_vm8, %v1002_v43  ;;  %v1890_v62 = vrot.slane %v1889_v61, 4 }
 0x189   : > { %2291 = vmatmul.msk.f32.gmra.mxu1 %vm3481_vm8, %v1002_v43  ;;  %v1891_v63 = vadd.f32 %v1890_v62, %v1889_v61 }
 0x18b   : > { %v1892_v46 = vrot.slane %v1891_v63, 2 }
 0x18d   : > { %v1893_v1 = vadd.f32 %v1892_v46, %v1891_v63 }
 0x18f   : > { %2288 = vmatmul.msk.f32.gmra.mxu0 %vm3481_vm8, %v1003_v33  ;;  %v1894_v21 = vrot.slane %v1893_v1, 1 }
 0x191   : > { %2292 = vmatmul.msk.f32.gmra.mxu1 %vm3481_vm8, %v1003_v33  ;;  %v1895_v9 = vadd.f32 %v1894_v21, %v1893_v1 }
 0x193   : > { %v1896_v16 = vmul.f32 %v1895_v9, %v1885_v52 }
 0x195   : > { %v1897_v55 = vadd.f32 1e-05, %v1896_v16 }
 0x197   : > { %2369 = vrsqrt.f32 %v1897_v55  ;;  %vm1904_vm14 = vweird.f32 %v1897_v55 }
 0x19d   : > { %v2998_v20 = vpop.eup %2369 }
 0x19e   : > { %v1899_v15 = vmul.f32 %v2998_v20, %v1897_v55  ;;  %vm1905_vm1 = vweird.f32 %v2998_v20 }
 0x19f   : > { %vm3038_vm2 = vmor %vm1904_vm14, %vm1905_vm1 }
 0x1a0   : > { %v1900_v13 = vmul.f32 %v2998_v20, %v1899_v15 }
 0x1a2   : > { %v1901_v43 = vmul.f32 0.5, %v1900_v13 }
 0x1a4   : > { %v1902_v4 = vsub.f32 1.5, %v1901_v43 }
 0x1a6   : > { %v1903_v52 = vmul.f32 %v2998_v20, %v1902_v4 }
 0x1a8   : > { %v1907_v1 = vsel %vm3038_vm2, %v2998_v20, %v1903_v52 }
 0x1a9   : > { %v3066_v55 = vmul.f32 %v1907_v1, %v2982_v56 }
 0x1f4   : > { %v1513_v12 = vpop.f32.mrf.mxu0 }
 0x1f5   : > { %v2987_v22 = vadd.f32 %v1513_v12, %v1466_v10 }
 0x1f6   : > { %v1542_v32 = vpop.f32.mrf.mxu1 }
 0x1f7   : > { %v2293_v8 = vmul.f32 -1.442695, %v2987_v22  ;;  %v2990_v24 = vadd.f32 %v1542_v32, %v1466_v10 }
 0x1f9   : > { %2371 = vpow2.f32 %v2293_v8  ;;  %v2294_v18 = vmul.f32 -1.442695, %v2990_v24 }
 0x1fc   : > { %v1516_v31 = vpop.f32.mrf.mxu0 }
 0x1fd   : > { %v2992_v48 = vadd.f32 %v1516_v31, %v1471_v19 }
 0x1fe   : > { %v1545_v35 = vpop.f32.mrf.mxu1 }
 0x1ff   : > { %v2295_v28 = vmul.f32 -1.442695, %v2992_v48  ;;  %v2996_v40 = vadd.f32 %v1545_v35, %v1471_v19  ;;  %v2372_v58 = vpop.eup %2371 }
 0x200   : > { %v3008_v14 = vadd.f32 1.0, %v2372_v58 }
 0x201   : > { %2373 = vpow2.f32 %v2295_v28  ;;  %v2296_v39 = vmul.f32 -1.442695, %v2996_v40 }
 0x202   : > { %2375 = vpow2.f32 %v2294_v18  ;;  %v1597_v32 = vand.u32 2147483648, %v3008_v14  ;;  %v1595_v8 = vand.u32 2147483647, %v3008_v14  ;;  %vm1591_vm11 = vweird.f32 %v3008_v14 }
 0x203   : > { %2377 = vpow2.f32 %v2296_v39 }
 0x204   : > { %v1519_v36 = vpop.f32.mrf.mxu0  ;;  %v3078_v39 = vor.u32 1.1754944e-38, %v1597_v32  ;;  %vm3121_vm1 = vcmp.eq.f32.partialorder %v1595_v8, 8.507059e+37 }
 0x205   : > { %v3002_v23 = vadd.f32 %v1519_v36, %v1476_v38 }
 0x206   : > { %v1548_v29 = vpop.f32.mrf.mxu1 }
 0x207   : > { %v2297_v0 = vmul.f32 -1.442695, %v3002_v23  ;;  %v3005_v3 = vadd.f32 %v1548_v29, %v1476_v38  ;;  %v2374_v17 = vpop.eup %2373 }
 0x208   : > { %v2376_v53 = vpop.eup %2375  ;;  %v3011_v41 = vadd.f32 1.0, %v2374_v17 }
 0x209   : > { %2379 = vpow2.f32 %v2297_v0  ;;  %v2298_v25 = vmul.f32 -1.442695, %v3005_v3  ;;  %v3016_v33 = vadd.f32 1.0, %v2376_v53  ;;  %v2378_v59 = vpop.eup %2377 }
 0x20a   : > { %v3023_v11 = vadd.f32 1.0, %v2378_v59  ;;  %v1627_v28 = vand.u32 2147483648, %v3011_v41  ;;  %vm1621_vm6 = vweird.f32 %v3011_v41  ;;  %v1625_v13 = vand.u32 2147483647, %v3011_v41 }
 0x20b   : > { %2381 = vpow2.f32 %v2298_v25  ;;  %v1610_v15 = vand.u32 2147483647, %v3016_v33  ;;  %v1612_v58 = vand.u32 2147483648, %v3016_v33 }
 0x20c   : > { %v1522_v47 = vpop.f32.mrf.mxu0  ;;  %2383 = vrcp.f32 %v3008_v14  ;;  %v3089_v53 = vor.u32 1.1754944e-38, %v1627_v28  ;;  %v1642_v4 = vand.u32 2147483648, %v3023_v11  ;;  %vm1636_vm13 = vweird.f32 %v3023_v11 }
 0x20d   : > { %v3013_v27 = vadd.f32 %v1522_v47, %v1481_v34  ;;  %2385 = vrcp.f32 %v3011_v41  ;;  %vm3110_vm4 = vcmp.eq.f32.partialorder %v1625_v13, 8.507059e+37 }
 0x20e   : > { %v1551_v5 = vpop.f32.mrf.mxu1  ;;  %2387 = vrcp.f32 %v3016_v33 }
 0x20f   : > { %v2299_v51 = vmul.f32 -1.442695, %v3013_v27  ;;  %v3020_v60 = vadd.f32 %v1551_v5, %v1481_v34  ;;  %v2380_v2 = vpop.eup %2379 }
 0x210   : > { %v3025_v26 = vadd.f32 1.0, %v2380_v2  ;;  %v1640_v2 = vand.u32 2147483647, %v3023_v11 }
 0x211   : > { %v2382_v30 = vpop.eup %2381  ;;  %2389 = vpow2.f32 %v2299_v51  ;;  %v2300_v45 = vmul.f32 -1.442695, %v3020_v60 }
 0x212   : > { %v3027_v37 = vpop.eup %2383  ;;  %2391 = vrcp.f32 %v3025_v26  ;;  %v3032_v49 = vadd.f32 1.0, %v2382_v30  ;;  %v1655_v0 = vand.u32 2147483647, %v3025_v26  ;;  %v1657_v17 = vand.u32 2147483648, %v3025_v26 }
 0x213   : > { %v3034_v50 = vpop.eup %2385  ;;  %2393 = vrcp.f32 %v3023_v11  ;;  %v1587_v57 = vmul.f32 %v3027_v37, %v3008_v14  ;;  %vm1592_vm7 = vweird.f32 %v3027_v37  ;;  %vm1651_vm10 = vweird.f32 %v3025_v26  ;;  %v822_v14 = vld [vmem:[%s3547_s7 + $0xa0] sm:$0xff] }
 0x214   : > { %2395 = vrcp.f32 %v3032_v49  ;;  %v3045_v61 = vpop.eup %2387  ;;  %v1617_v63 = vmul.f32 %v3034_v50, %v3011_v41  ;;  %vm1622_vm12 = vweird.f32 %v3034_v50  ;;  %vm3105_vm3 = vcmp.eq.f32.partialorder %v1655_v0, 8.507059e+37  ;;  %v811_v41 = vld [vmem:[%s3547_s7 + $0x48] sm:$0xff] }
 0x215   : > { %2397 = vpow2.f32 %v2300_v45  ;;  %v1588_v21 = vsub.f32 1.0, %v1587_v57  ;;  %v1602_v34 = vmul.f32 %v3045_v61, %v3016_v33  ;;  %v1658_v54 = vor.u32 1.1754944e-38, %v1657_v17  ;;  %vm3130_vm5 = vmor %vm1621_vm6, %vm1622_vm12 }
 0x216   : > { %v1618_v19 = vsub.f32 1.0, %v1617_v63  ;;  %vm1607_vm15 = vweird.f32 %v3045_v61  ;;  %vm1666_vm14 = vweird.f32 %v3032_v49  ;;  %v1670_v28 = vand.u32 2147483647, %v3032_v49 }
 0x217   : > { %v2390_v62 = vpop.eup %2389  ;;  %v1589_v20 = vmul.f32 %v3027_v37, %v1588_v21  ;;  %v1603_v36 = vsub.f32 1.0, %v1602_v34 }
 0x218   : > { %v3049_v46 = vpop.eup %2391  ;;  %v3058_v12 = vadd.f32 1.0, %v2390_v62  ;;  %v1619_v29 = vmul.f32 %v3034_v50, %v1618_v19  ;;  %v814_v19 = vld [vmem:[%s3547_s7 + $0x60] sm:$0xff] }
 0x219   : > { %v1647_v9 = vmul.f32 %v3049_v46, %v3025_v26  ;;  %v3060_v16 = vpop.eup %2393  ;;  %v3093_v59 = vadd.f32 %v3027_v37, %v1589_v20  ;;  %v1604_v5 = vmul.f32 %v3045_v61, %v1603_v36  ;;  %vm1652_vm9 = vweird.f32 %v3049_v46 }
 0x21a   : > { %v3063_v10 = vpop.eup %2395  ;;  %2399 = vrcp.f32 %v3058_v12  ;;  %v1632_v38 = vmul.f32 %v3060_v16, %v3023_v11  ;;  %v1620_v45 = vadd.f32 %v3034_v50, %v1619_v29  ;;  %vm1637_vm0 = vweird.f32 %v3060_v16  ;;  %vm3143_vm2 = vmor %vm1651_vm10, %vm1652_vm9  ;;  %v1912_v11 = vpop.permute.xlu1 %1911 }
 0x21b   : > { %v2398_v31 = vpop.eup %2397  ;;  %v1648_v35 = vsub.f32 1.0, %v1647_v9  ;;  %v1662_v18 = vmul.f32 %v3063_v10, %v3032_v49  ;;  %v1685_v9 = vand.u32 2147483647, %v3058_v12  ;;  %v1687_v32 = vand.u32 2147483648, %v3058_v12  ;;  %vm3160_vm9 = vmor %vm1591_vm11, %vm1592_vm7 }
 0x21c   : > { %v3076_v56 = vadd.f32 1.0, %v2398_v31  ;;  %v1633_v51 = vsub.f32 1.0, %v1632_v38  ;;  %v1624_v8 = vsel %vm3130_vm5, %v3034_v50, %v1620_v45  ;;  %vm1667_vm6 = vweird.f32 %v3063_v10  ;;  %vm3184_vm7 = vmor %vm1636_vm13, %vm1637_vm0  ;;  %v830_v31 = vld [vmem:[%s3547_s7 + $0xe0] sm:$0xff] }
 0x21d   : > { %v1649_v25 = vmul.f32 %v3049_v46, %v1648_v35  ;;  %v1663_v47 = vsub.f32 1.0, %v1662_v18  ;;  %v1672_v20 = vand.u32 2147483648, %v3032_v49  ;;  %vm1681_vm12 = vweird.f32 %v3058_v12 }
 0x21e   : > { %2401 = vrcp.f32 %v3076_v56  ;;  %v1634_v34 = vmul.f32 %v3060_v16, %v1633_v51  ;;  %vm1686_vm10 = vcmp.eq.f32.partialorder %v1685_v9, 8.507059e+37  ;;  %v1688_v0 = vor.u32 1.1754944e-38, %v1687_v32  ;;  %v815_v9 = vld [vmem:[%s3547_s7 + $0x68] sm:$0xff] }
 0x21f   : > { %v1650_v62 = vadd.f32 %v3049_v46, %v1649_v25  ;;  %v1664_v63 = vmul.f32 %v3063_v10, %v1663_v47  ;;  %v1702_v17 = vand.u32 2147483648, %v3076_v56  ;;  %v1700_v25 = vand.u32 2147483647, %v3076_v56  ;;  %v831_v32 = vld [vmem:[%s3547_s7 + $0xe8] sm:$0xff] }
 0x220   : > { %v2400_v43 = vpop.eup %2399  ;;  %v1635_v26 = vadd.f32 %v3060_v16, %v1634_v34  ;;  %v1594_v47 = vsel %vm3160_vm9, %v3027_v37, %v3093_v59  ;;  %v1605_v51 = vadd.f32 %v3045_v61, %v1604_v5  ;;  %vm1696_vm11 = vweird.f32 %v3076_v56 }
 0x221   : > { %v1677_v30 = vmul.f32 %v2400_v43, %v3058_v12  ;;  %vm1682_vm8 = vweird.f32 %v2400_v43  ;;  %v1654_v36 = vsel %vm3143_vm2, %v3049_v46, %v1650_v62  ;;  %v1665_v50 = vadd.f32 %v3063_v10, %v1664_v63 }
 0x222   : > { %vm1683_vm5 = vmor %vm1681_vm12, %vm1682_vm8  ;;  %v1629_v45 = vsel %vm3110_vm4, %v3089_v53, %v1624_v8  ;;  %v1673_v52 = vor.u32 1.1754944e-38, %v1672_v20  ;;  %v1639_v62 = vsel %vm3184_vm7, %v3060_v16, %v1635_v26  ;;  %vm1701_vm0 = vcmp.eq.f32.partialorder %v1700_v25, 8.507059e+37  ;;  %v828_v8 = vld [vmem:[%s3547_s7 + $0xd0] sm:$0xff]  ;;  %v827_v20 = vld [vmem:[%s3547_s7 + $0xc8] sm:$0xff] }
 0x223   : > { %v1678_v1 = vsub.f32 1.0, %v1677_v30  ;;  %v1659_v30 = vsel %vm3105_vm3, %v1658_v54, %v1654_v36  ;;  %vm3176_vm8 = vmor %vm1666_vm14, %vm1667_vm6  ;;  %vm1671_vm3 = vcmp.eq.f32.partialorder %v1670_v28, 8.507059e+37  ;;  %v1703_v54 = vor.u32 1.1754944e-38, %v1702_v17  ;;  %v813_v28 = vld [vmem:[%s3547_s7 + $0x58] sm:$0xff]  ;;  %v810_v36 = vld [vmem:[%s3547_s7 + $0x40] sm:$0xff] }
 0x224   : > { %v2402_v21 = vpop.eup %2401  ;;  %v1669_v59 = vsel %vm3176_vm8, %v3063_v10, %v1665_v50  ;;  %v3203_v10 = vmul.f32 %v1659_v30, %v3002_v23  ;;  %vm3541_vm4 = vweird.f32 %v3016_v33  ;;  %v1643_v23 = vor.u32 1.1754944e-38, %v1642_v4  ;;  %v826_v50 = vld [vmem:[%s3547_s7 + $0xc0] sm:$0xff]  ;;  %v809_v26 = vld [vmem:[%s3547_s7 + $0x38] sm:$0xff]  ;;  %v807_v25 = vld [vmem:[%s3547_s7 + $0x28] sm:$0xff] }
 0x225   : > { %v1679_v35 = vmul.f32 %v2400_v43, %v1678_v1  ;;  %v1692_v18 = vmul.f32 %v2402_v21, %v3076_v56  ;;  %vm1697_vm2 = vweird.f32 %v2402_v21  ;;  %v1599_v56 = vsel %vm3121_vm1, %v3078_v39, %v1594_v47  ;;  %vm3213_vm14 = vmor %vm3541_vm4, %vm1607_vm15  ;;  %v823_v47 = vld [vmem:[%s3547_s7 + $0xa8] sm:$0xff]  ;;  %v806_v30 = vld [vmem:[%s3547_s7 + $0x20] sm:$0xff] }
 0x226   : > { %vm1698_vm13 = vmor %vm1696_vm11, %vm1697_vm2  ;;  %v1674_v16 = vsel %vm1671_vm3, %v1673_v52, %v1669_v59  ;;  %v1609_v63 = vsel %vm3213_vm14, %v3045_v61, %v1605_v51  ;;  %v3223_v1 = vmul.f32 %v1629_v45, %v2992_v48  ;;  %vm1641_vm1 = vcmp.eq.f32.partialorder %v1640_v2, 8.507059e+37  ;;  %v832_v2 = vld [vmem:[%s3547_s7 + $0xf0] sm:$0xff]  ;;  %v805_v59 = vld [vmem:[%s3547_s7 + $0x18] sm:$0xff] }
 0x227   : > { %v1680_v38 = vadd.f32 %v2400_v43, %v1679_v35  ;;  %v1693_v29 = vsub.f32 1.0, %v1692_v18  ;;  %v1613_v4 = vor.u32 1.1754944e-38, %v1612_v58  ;;  %v3234_v34 = vmul.f32 %v1599_v56, %v2987_v22  ;;  %v829_v35 = vld [vmem:[%s3547_s7 + $0xd8] sm:$0xff]  ;;  %v812_v18 = vld [vmem:[%s3547_s7 + $0x50] sm:$0xff]  ;;  %v802_v53 = vld [vmem:[%s3547_s7] sm:$0xff] }
 0x228   : > { %vm1611_vm15 = vcmp.eq.f32.partialorder %v1610_v15, 8.507059e+37  ;;  %v3239_v48 = vmul.f32 %v1674_v16, %v3005_v3  ;;  %v1914_v58 = vmul.f32 %v1912_v11, %v3066_v55  ;;  %v1918_v3 = vpop.permute.xlu2 %1917  ;;  %vm3544_vm6 = vcmask 261120   ;;  %v833_v55 = vld [vmem:[%s3547_s7 + $0xf8] sm:$0xff]  ;;  %v804_v52 = vld [vmem:[%s3547_s7 + $0x10] sm:$0xff] }
 0x229   : > { %v1684_v46 = vsel %vm1683_vm5, %v2400_v43, %v1680_v38  ;;  %v1694_v13 = vmul.f32 %v2402_v21, %v1693_v29  ;;  %v1614_v61 = vsel %vm1611_vm15, %v1613_v4, %v1609_v63  ;;  %vm3545_vm12 = vmmov %vm3544_vm6  ;;  %vm3546_vm5 = vcmask 1045504   ;;  %1842 = vmatpush.msra.mxu1 %v833_v55  ;;  %v1717_v38 = vpop.permute.xlu0 %1716 }
 0x22a   : > { %v1689_v43 = vsel %vm1686_vm10, %v1688_v0, %v1684_v46  ;;  %v3254_v33 = vmul.f32 %v1614_v61, %v2990_v24  ;;  %v1920_v15 = vadd.f32 %v1918_v3, %v1914_v58  ;;  %v816_v24 = vld [vmem:[%s3547_s7 + $0x70] sm:$0xff]  ;;  %v1719_v29 = vperm.slane %v1717_v38, 0  ;;  %v825_v0 = vld [vmem:[%s3547_s7 + $0xb8] sm:$0xff]  ;;  %vm3550_vm14 = vmmov %vm3544_vm6 }
 0x22b   : > { %v3192_v5 = vmul.f32 %v1689_v43, %v3013_v27  ;;  %v1695_v49 = vadd.f32 %v2402_v21, %v1694_v13  ;;  %1843 = vmatpush.msra.mxu1 %v832_v2  ;;  %v808_v46 = vld [vmem:[%s3547_s7 + $0x30] sm:$0xff] }
 0x22c   : > { %v824_v13 = vld [vmem:[%s3547_s7 + $0xb0] sm:$0xff] }
 0x22d   : > { %v1699_v27 = vsel %vm1698_vm13, %v2402_v21, %v1695_v49  ;;  %1735 = vmatpush.msra.mxu2 %v3192_v5  ;;  %v1644_v21 = vsel %vm1641_vm1, %v1643_v23, %v1639_v62  ;;  %1844 = vmatpush.msra.mxu1 %v831_v32  ;;  %v821_v49 = vld [vmem:[%s3547_s7 + $0x98] sm:$0xff]  ;;  %v803_v62 = vld [vmem:[%s3547_s7 + $0x8] sm:$0xff]  ;;  %v818_v23 = vld [vmem:[%s3547_s7 + $0x80] sm:$0xff] }
 0x22e   : > { %v1704_v57 = vsel %vm1701_vm0, %v1703_v54, %v1699_v27  ;;  %v3248_v22 = vmul.f32 %v1644_v21, %v2996_v40  ;;  %v817_v40 = vld [vmem:[%s3547_s7 + $0x78] sm:$0xff]  ;;  %v820_v54 = vld [vmem:[%s3547_s7 + $0x90] sm:$0xff]  ;;  %v819_v27 = vld [vmem:[%s3547_s7 + $0x88] sm:$0xff]  ;;  %vm3548_vm0 = vcmask 48128  }
 0x22f   : > { %v3228_v39 = vmul.f32 %v1704_v57, %v3020_v60  ;;  %1736 = vmatpush.msra.mxu2 %v3203_v10  ;;  %v1008_v60 = vld [vmem:[%s3453_s12] sm:$0x1]  ;;  %1813 = vmatpush.msra.mxu0 %v817_v40  ;;  %vm3549_vm4 = vmmov %vm3548_vm0 }
 0x230   : > { %1845 = vmatpush.msra.mxu1 %v830_v31  ;;  %vm3551_vm1 = vmmov %vm3544_vm6 }
 0x231   : > { %1755 = vmatpush.msra.mxu3 %v3228_v39  ;;  %1737 = vmatpush.msra.mxu2 %v3223_v1 }
 0x232   : > { %1814 = vmatpush.msra.mxu0 %v816_v24  ;;  %1846 = vmatpush.msra.mxu1 %v829_v35  ;;  %v982_v24 = vmul.f32 %v2735_v6, %v2712_v42 }
 0x233   : > { %1756 = vmatpush.msra.mxu3 %v3239_v48  ;;  %1738 = vmatpush.msra.mxu2 %v3234_v34 }
 0x234   : > { %2301 = vmatmul.msk.f32.vlgmr.msra.gmra.mxu2 %vm3544_vm6, %v1008_v60  ;;  %1815 = vmatpush.msra.mxu0 %v815_v9 }
 0x235   : > { %1757 = vmatpush.msra.mxu3 %v3248_v22  ;;  %1847 = vmatpush.msra.mxu1 %v828_v8 }
 0x236   : > { %1816 = vmatpush.msra.mxu0 %v814_v19 }
 0x237   : > { %1758 = vmatpush.msra.mxu3 %v3254_v33  ;;  %1848 = vmatpush.msra.mxu1 %v827_v20 }
 0x238   : > { %2302 = vmatmul.msk.f32.vlgmr.msra.gmra.mxu3 %vm3545_vm12, %v1008_v60  ;;  %1817 = vmatpush.msra.mxu0 %v813_v28 }
 0x239   : > { %2307 = vmatpush.msk.msrb.mxu3 %vm3546_vm5, %v1920_v15  ;;  %1849 = vmatpush.msra.mxu1 %v826_v50 }
 0x23a   : > { %1818 = vmatpush.msra.mxu0 %v812_v18 }
 0x23b   : > { %1850 = vmatpush.msra.mxu1 %v825_v0 }
 0x23c   : > { %1819 = vmatpush.msra.mxu0 %v811_v41  ;;  %v983_v41 = vmul.f32 %v2737_v7, %v2716_v44 }
 0x23d   : > { %1851 = vmatpush.msra.mxu1 %v824_v13 }
 0x23e   : > { %1820 = vmatpush.msra.mxu0 %v810_v36 }
 0x23f   : > { %1852 = vmatpush.msra.mxu1 %v823_v47 }
 0x240   : > { %1821 = vmatpush.msra.mxu0 %v809_v26 }
 0x241   : > { %1853 = vmatpush.msra.mxu1 %v822_v14  ;;  %v1014_v14 = vld [vmem:[%s3458_s17] sm:$0xff] }
 0x242   : > { %1822 = vmatpush.msra.mxu0 %v808_v46 }
 0x243   : > { %1854 = vmatpush.msra.mxu1 %v821_v49 }
 0x244   : > { %1823 = vmatpush.msra.mxu0 %v807_v25 }
 0x245   : > { %1855 = vmatpush.msra.mxu1 %v820_v54 }
 0x246   : > { %1824 = vmatpush.msra.mxu0 %v806_v30 }
 0x247   : > { %1856 = vmatpush.msra.mxu1 %v819_v27 }
 0x248   : > { %1825 = vmatpush.msra.mxu0 %v805_v59 }
 0x249   : > { %1857 = vmatpush.msra.mxu1 %v818_v23 }
 0x24a   : > { %1826 = vmatpush.msra.mxu0 %v804_v52 }
 0x24c   : > { %1827 = vmatpush.msra.mxu0 %v803_v62 }
 0x24e   : > { %1828 = vmatpush.msra.mxu0 %v802_v53  ;;  %v1990_v53 = vpop.permute.xlu0 %1989 }
 0x2b7   : > { %v1740_v17 = vpop.f32.mrf.mxu2 }
 0x2b8   : > { %v1741_v12 = vadd.f32 %v1740_v17, %v1719_v29 }
 0x2ba   : > { %v2303_v51 = vmul.f32 -1.442695, %v1741_v12 }
 0x2bb   : > { %v1760_v43 = vpop.f32.mrf.mxu3 }
 0x2bc   : > { %2403 = vpow2.f32 %v2303_v51  ;;  %v1761_v37 = vadd.f32 %v1760_v43, %v1719_v29  ;;  %v1015_v43 = vld [vmem:[%s3458_s17 + $0x8] sm:$0xf] }
 0x2be   : > { %v2304_v45 = vmul.f32 -1.442695, %v1761_v37 }
 0x2c0   : > { %2405 = vpow2.f32 %v2304_v45  ;;  %v1985_v45 = vpop.permute.xlu1 %1984 }
 0x2c2   : > { %v2404_v56 = vpop.eup %2403 }
 0x2c3   : > { %v1769_v16 = vadd.f32 1.0, %v2404_v56 }
 0x2c5   : > { %2407 = vrcp.f32 %v1769_v16  ;;  %v1780_v61 = vand.u32 2147483647, %v1769_v16  ;;  %v1782_v58 = vand.u32 2147483648, %v1769_v16  ;;  %vm1776_vm9 = vweird.f32 %v1769_v16 }
 0x2c6   : > { %v2406_v57 = vpop.eup %2405 }
 0x2c7   : > { %v1770_v63 = vadd.f32 1.0, %v2406_v57  ;;  %vm1781_vm8 = vcmp.eq.f32.partialorder %v1780_v61, 8.507059e+37  ;;  %v1783_v2 = vor.u32 1.1754944e-38, %v1782_v58 }
 0x2c9   : > { %2409 = vrcp.f32 %v1770_v63  ;;  %v1797_v9 = vand.u32 2147483648, %v1770_v63  ;;  %v1795_v31 = vand.u32 2147483647, %v1770_v63  ;;  %vm1791_vm11 = vweird.f32 %v1770_v63 }
 0x2cb   : > { %v2408_v4 = vpop.eup %2407  ;;  %v1798_v8 = vor.u32 1.1754944e-38, %v1797_v9  ;;  %vm1796_vm13 = vcmp.eq.f32.partialorder %v1795_v31, 8.507059e+37 }
 0x2cc   : > { %v1772_v21 = vmul.f32 %v2408_v4, %v1769_v16  ;;  %vm1777_vm10 = vweird.f32 %v2408_v4 }
 0x2cd   : > { %vm1778_vm2 = vmor %vm1776_vm9, %vm1777_vm10 }
 0x2ce   : > { %v1773_v60 = vsub.f32 1.0, %v1772_v21 }
 0x2cf   : > { %v2410_v11 = vpop.eup %2409 }
 0x2d0   : > { %v1774_v3 = vmul.f32 %v2408_v4, %v1773_v60  ;;  %v1787_v15 = vmul.f32 %v2410_v11, %v1770_v63  ;;  %vm1792_vm7 = vweird.f32 %v2410_v11 }
 0x2d1   : > { %vm1793_vm3 = vmor %vm1791_vm11, %vm1792_vm7  ;;  %vm2043_vm7 = vcmask 1043456   ;;  %vm2039_vm11 = vcmask 97280  }
 0x2d2   : > { %v1775_v40 = vadd.f32 %v2408_v4, %v1774_v3  ;;  %v1788_v55 = vsub.f32 1.0, %v1787_v15 }
 0x2d4   : > { %v1779_v32 = vsel %vm1778_vm2, %v2408_v4, %v1775_v40  ;;  %v1789_v19 = vmul.f32 %v2410_v11, %v1788_v55 }
 0x2d5   : > { %v1784_v28 = vsel %vm1781_vm8, %v1783_v2, %v1779_v32 }
 0x2d6   : > { %v1790_v35 = vadd.f32 %v2410_v11, %v1789_v19  ;;  %v1801_v18 = vmul.f32 %v1784_v28, %v982_v24 }
 0x2d8   : > { %v1794_v20 = vsel %vm1793_vm3, %v2410_v11, %v1790_v35  ;;  %v1803_v42 = vperm.slane %v1801_v18, 0  ;;  %vm3552_vm3 = vcmask 128000  }
 0x2d9   : > { %v1799_v6 = vsel %vm1796_vm13, %v1798_v8, %v1794_v20  ;;  %vm3553_vm13 = vcmask 1045504  }
 0x2da   : > { %v1805_v36 = vmul.f32 %v1803_v42, %v3234_v34  ;;  %v1802_v50 = vmul.f32 %v1799_v6, %v983_v41  ;;  %v1807_v26 = vmul.f32 %v1803_v42, %v3223_v1  ;;  %v1809_v44 = vmul.f32 %v1803_v42, %v3203_v10  ;;  %v1012_v1 = vld [vmem:[%s3457_s16] sm:$0xff] }
 0x2db   : > { %v1811_v34 = vmul.f32 %v1803_v42, %v3192_v5  ;;  %2308 = vmatmul.msk.f32.vlgmr.msrb.gmra.mxu3 %vm3548_vm0, %v1012_v1  ;;  %v2070_v1 = vld [vmem:[%s3462_s21 + $0x10] sm:$0xff] }
 0x2dc   : > { %1829 = vmatmul.f32.vlgmr.msra.gmra.mxu0 %v1805_v36  ;;  %v1804_v38 = vperm.slane %v1802_v50, 0  ;;  %v1018_v36 = vld [vmem:[%s3460_s19] sm:$0x3f]  ;;  %v2037_v50 = vpop.permute.xlu2 %2036 }
 0x2de   : > { %v1806_v29 = vmul.f32 %v1804_v38, %v3254_v33  ;;  %v1808_v0 = vmul.f32 %v1804_v38, %v3248_v22  ;;  %v1810_v7 = vmul.f32 %v1804_v38, %v3239_v48  ;;  %v1812_v17 = vmul.f32 %v1804_v38, %v3228_v39  ;;  %v1013_v48 = vld [vmem:[%s3457_s16 + $0x8] sm:$0xf] }
 0x2e0   : > { %1858 = vmatmul.f32.vlgmr.msra.gmra.mxu1 %v1806_v29 }
 0x2e3   : > { %2309 = vmatmul.msk.f32.gmra.mxu3 %vm3549_vm4, %v1013_v48  ;;  %vm3554_vm4 = vmmov %vm3548_vm0 }
 0x2e4   : > { %1832 = vmatmul.f32.gmra.mxu0 %v1807_v26  ;;  %v2334_v26 = vld [vmem:[%s2611_s3] ss:$0 sm:$0xff]  ;;  %s790_s3 = scalar_lea.vmem %s3466_s25, %s3559_s30 }
 0x2e8   : > { %1861 = vmatmul.f32.gmra.mxu1 %v1808_v0  ;;  %v2419_v0 = vld [vmem:[%s2623_s2] sm:$0x3f] }
 0x2ec   : > { %1835 = vmatmul.f32.gmra.mxu0 %v1809_v44 }
 0x2f0   : > { %1864 = vmatmul.f32.gmra.mxu1 %v1810_v7 }
 0x2f4   : > { %1838 = vmatmul.f32.gmra.mxu0 %v1811_v34 }
 0x2f8   : > { %1867 = vmatmul.f32.gmra.mxu1 %v1812_v17  ;;  %v2068_v17 = vld [vmem:[%s3462_s21] sm:$0xff] }
 0x359   : > { %v1830_v33 = vpop.f32.mrf.mxu0 }
 0x35d   : > { %v1859_v12 = vpop.f32.mrf.mxu1 }
 0x35e   : > { %v1860_v30 = vadd.f32 %v1859_v12, %v1830_v33  ;;  %v1976_v37 = vpop.f32.mrf.mxu3  ;;  %v2069_v12 = vld [vmem:[%s3462_s21 + $0x8] sm:$0xff] }
 0x361   : > { %v1833_v22 = vpop.f32.mrf.mxu0 }
 0x365   : > { %v1862_v10 = vpop.f32.mrf.mxu1 }
 0x366   : > { %v1863_v51 = vadd.f32 %v1862_v10, %v1833_v22  ;;  %v1979_v62 = vpop.f32.mrf.mxu3  ;;  %v2071_v22 = vld [vmem:[%s3462_s21 + $0x18] sm:$0xff]  ;;  %v2072_v10 = vld [vmem:[%s3463_s22] sm:$0xff] }
 0x369   : > { %v1836_v5 = vpop.f32.mrf.mxu0 }
 0x36d   : > { %v1865_v46 = vpop.f32.mrf.mxu1 }
 0x36e   : > { %v1866_v47 = vadd.f32 %v1865_v46, %v1836_v5 }
 0x371   : > { %v1839_v39 = vpop.f32.mrf.mxu0 }
 0x375   : > { %v1868_v13 = vpop.f32.mrf.mxu1 }
 0x376   : > { %v1869_v25 = vadd.f32 %v1868_v13, %v1839_v39  ;;  %v2073_v39 = vld [vmem:[%s3463_s22 + $0x8] sm:$0xff] }
 0x378   : > { %1939 = vmatpush.msrb.mxu2 %v1869_v25 }
 0x37a   : > { %1940 = vmatpush.msrb.mxu2 %v1866_v47 }
 0x37c   : > { %1941 = vmatpush.msrb.mxu2 %v1863_v51  ;;  %v2074_v51 = vld [vmem:[%s3463_s22 + $0x10] sm:$0xff] }
 0x37e   : > { %1942 = vmatpush.msrb.mxu2 %v1860_v30 }
 0x37f   : > { %2305 = vmatmul.msk.f32.vlgmr.msrb.gmra.mxu2 %vm3550_vm14, %v1014_v14  ;;  %vm3555_vm14 = vmmov %vm3548_vm0 }
 0x387   : > { %2306 = vmatmul.msk.f32.gmra.mxu2 %vm3551_vm1, %v1015_v43  ;;  %vm3556_vm1 = vmmov %vm3548_vm0 }
 0x402   : > { %v1944_v59 = vpop.f32.mrf.mxu2 }
 0x403   : > { %v1977_v49 = vadd.f32 %v1976_v37, %v1944_v59  ;;  %v2075_v37 = vld [vmem:[%s3463_s22 + $0x18] sm:$0xff] }
 0x405   : > { %v1992_v52 = vadd.f32 %v1985_v45, %v1977_v49 }
 0x407   : > { %v2310_v54 = vmul.f32 -1.442695, %v1992_v52 }
 0x409   : > { %2411 = vpow2.f32 %v2310_v54 }
 0x40a   : > { %v1947_v27 = vpop.f32.mrf.mxu2 }
 0x40b   : > { %v1980_v56 = vadd.f32 %v1979_v62, %v1947_v27  ;;  %v2076_v62 = vld [vmem:[%s3464_s23] sm:$0xff]  ;;  %v2077_v27 = vld [vmem:[%s3464_s23 + $0x8] sm:$0xff] }
 0x40d   : > { %v1993_v23 = vadd.f32 %v1990_v53, %v1980_v56  ;;  %v2078_v53 = vld [vmem:[%s3464_s23 + $0x10] sm:$0xff] }
 0x40f   : > { %v2412_v16 = vpop.eup %2411  ;;  %v2311_v57 = vmul.f32 -1.442695, %v1993_v23 }
 0x410   : > { %v2000_v63 = vadd.f32 1.0, %v2412_v16  ;;  %v2079_v16 = vld [vmem:[%s3464_s23 + $0x18] sm:$0xff] }
 0x411   : > { %2413 = vpow2.f32 %v2311_v57 }
 0x412   : > { %2415 = vrcp.f32 %v2000_v63  ;;  %vm2007_vm6 = vweird.f32 %v2000_v63  ;;  %v2013_v2 = vand.u32 2147483648, %v2000_v63  ;;  %v2011_v19 = vand.u32 2147483647, %v2000_v63 }
 0x414   : > { %v2014_v18 = vor.u32 1.1754944e-38, %v2013_v2  ;;  %vm2012_vm8 = vcmp.eq.f32.partialorder %v2011_v19, 8.507059e+37 }
 0x417   : > { %v2414_v4 = vpop.eup %2413 }
 0x418   : > { %v2416_v21 = vpop.eup %2415  ;;  %v2001_v60 = vadd.f32 1.0, %v2414_v4 }
 0x419   : > { %v2003_v11 = vmul.f32 %v2416_v21, %v2000_v63  ;;  %vm2008_vm15 = vweird.f32 %v2416_v21 }
 0x41a   : > { %2417 = vrcp.f32 %v2001_v60  ;;  %v2028_v24 = vand.u32 2147483648, %v2001_v60  ;;  %v2026_v32 = vand.u32 2147483647, %v2001_v60  ;;  %vm2009_vm5 = vmor %vm2007_vm6, %vm2008_vm15  ;;  %vm2022_vm10 = vweird.f32 %v2001_v60 }
 0x41b   : > { %v2004_v61 = vsub.f32 1.0, %v2003_v11 }
 0x41c   : > { %v2029_v35 = vor.u32 1.1754944e-38, %v2028_v24  ;;  %vm2027_vm2 = vcmp.eq.f32.partialorder %v2026_v32, 8.507059e+37  ;;  %v2080_v24 = vld [vmem:[%s3465_s24] sm:$0x1] }
 0x41d   : > { %v2005_v58 = vmul.f32 %v2416_v21, %v2004_v61 }
 0x41f   : > { %v2006_v55 = vadd.f32 %v2416_v21, %v2005_v58 }
 0x420   : > { %v2418_v3 = vpop.eup %2417 }
 0x421   : > { %v2018_v15 = vmul.f32 %v2418_v3, %v2001_v60  ;;  %vm2023_vm12 = vweird.f32 %v2418_v3  ;;  %v2010_v28 = vsel %vm2009_vm5, %v2416_v21, %v2006_v55 }
 0x422   : > { %vm2024_vm9 = vmor %vm2022_vm10, %vm2023_vm12  ;;  %v2015_v20 = vsel %vm2012_vm8, %v2014_v18, %v2010_v28 }
 0x423   : > { %v2019_v40 = vsub.f32 1.0, %v2018_v15  ;;  %v2032_v6 = vmul.f32 %v2015_v20, %v1992_v52 }
 0x425   : > { %v2020_v9 = vmul.f32 %v2418_v3, %v2019_v40 }
 0x427   : > { %v2021_v31 = vadd.f32 %v2418_v3, %v2020_v9 }
 0x429   : > { %v2025_v8 = vsel %vm2024_vm9, %v2418_v3, %v2021_v31 }
 0x42a   : > { %v2030_v41 = vsel %vm2027_vm2, %v2029_v35, %v2025_v8 }
 0x42b   : > { %v2033_v42 = vmul.f32 %v2030_v41, %v1993_v23 }
 0x42d   : > { %2312 = vmatpush.msk.msra.mxu2 %vm2043_vm7, %v2033_v42 }
 0x42f   : > { %2062 = vmatpush.msra.mxu2 %v2032_v6 }
 0x430   : > { %2313 = vmatmul.msk.f32.vlgmr.msra.gmra.mxu2 %vm2039_vm11, %v1018_v36 }
 0x4b3   : > { %v2064_v38 = vpop.f32.mrf.mxu2 }
 0x4b4   : > { %v2065_v29 = vadd.f32 %v2064_v38, %v2037_v50 }
 0x4b6   : > { %v2067_v44 = vadd.f32 %v2419_v0, %v2065_v29 }
 0x4b8   : > { %v2083_v7 = vmul.f32 %v2334_v26, %v2067_v44 }
 0x4ba   : > { %v2084_v34 = vsel %vm3552_vm3, %v2083_v7, 0.0 }
 0x4bb   : > { %2085 = vadd.xlane.f32.xlu0 %v2084_v34 }
 0x52e   : > { %v2086_v33 = vpop.xlane.xlu0 %2085 }
 0x52f   : > { %2314 = vmatpush.msk.msra.mxu3 %vm3553_vm13, %v2086_v33 }
 0x530   : > { %2315 = vmatmul.msk.f32.vlgmr.msra.gmra.mxu3 %vm3548_vm0, %v2068_v17 }
 0x538   : > { %2316 = vmatmul.msk.f32.gmra.mxu3 %vm3554_vm4, %v2069_v12 }
 0x540   : > { %2317 = vmatmul.msk.f32.gmra.mxu3 %vm3555_vm14, %v2070_v1 }
 0x548   : > { %2318 = vmatmul.msk.f32.gmra.mxu3 %vm3556_vm1, %v2071_v22 }
 0x5b3   : > { %v2119_v48 = vpop.f32.mrf.mxu3 }
 0x5b4   : > { %v2120_v5 = vadd.f32 %v2119_v48, %v2072_v10 }
 0x5b6   : > { %v2131_v46 = vmax.f32 %v2120_v5, 0.0 }
 0x5b8   : > { %2137 = vperm.xlu1 %2332, %v2131_v46  }
 0x5bb   : > { %v2122_v13 = vpop.f32.mrf.mxu3 }
 0x5bc   : > { %v2123_v25 = vadd.f32 %v2122_v13, %v2073_v39 }
 0x5be   : > { %v2132_v47 = vmax.f32 %v2123_v25, 0.0 }
 0x5c0   : > { %2142 = vperm.xlu2 %2333, %v2132_v47  }
 0x5c3   : > { %v2125_v30 = vpop.f32.mrf.mxu3 }
 0x5c4   : > { %v2126_v14 = vadd.f32 %v2125_v30, %v2074_v51 }
 0x5c6   : > { %v2133_v43 = vmax.f32 %v2126_v14, 0.0 }
 0x5c8   : > { %2147 = vperm.xlu1 %2332, %v2133_v43  }
 0x5cb   : > { %v2128_v59 = vpop.f32.mrf.mxu3 }
 0x5cc   : > { %v2129_v49 = vadd.f32 %v2128_v59, %v2075_v37 }
 0x5ce   : > { %v2134_v45 = vmax.f32 %v2129_v49, 0.0 }
 0x5d0   : > { %2152 = vperm.xlu2 %2333, %v2134_v45  }
 0x61a   : > { %v2143_v52 = vpop.permute.xlu2 %2142 }
 0x61b   : > { %v2156_v23 = vmul.f32 %v2143_v52, %v2077_v27 }
 0x62a   : > { %v2138_v54 = vpop.permute.xlu1 %2137  ;;  %v2153_v57 = vpop.permute.xlu2 %2152 }
 0x62b   : > { %v2155_v56 = vmul.f32 %v2138_v54, %v2076_v62  ;;  %v2158_v60 = vmul.f32 %v2153_v57, %v2079_v16 }
 0x62d   : > { %v2159_v4 = vadd.f32 %v2156_v23, %v2155_v56 }
 0x63a   : > { %v2148_v63 = vpop.permute.xlu1 %2147 }
 0x63b   : > { %v2157_v21 = vmul.f32 %v2148_v63, %v2078_v53 }
 0x63d   : > { %v2160_v11 = vadd.f32 %v2159_v4, %v2157_v21 }
 0x63f   : > { %v2161_v61 = vadd.f32 %v2160_v11, %v2158_v60 }
 0x641   : > { %v2162_v58 = vrot.slane %v2161_v61, 4 }
 0x643   : > { %v2163_v3 = vadd.f32 %v2162_v58, %v2161_v61 }
 0x645   : > { %v2164_v15 = vrot.slane %v2163_v3, 2 }
 0x647   : > { %v2165_v40 = vadd.f32 %v2164_v15, %v2163_v3 }
 0x649   : > { %v2166_v55 = vrot.slane %v2165_v40, 1 }
 0x64b   : > { %v2167_v2 = vadd.f32 %v2166_v55, %v2165_v40 }
 0x64d   : > { %v2168_v9 = vadd.f32 %v2167_v2, %v2080_v24 }
 0x64f   : > { %2169 = vst [vmem:[%s790_s3] sm:$0x1] %v2168_v9 }
 0x650 PF: > { %s3557_s2 = sld [smem:[#allocation3_spill]] }
 0x656   : > { %s37_s6 = sadd.s32 1, %s3557_s2  }
 0x657   : > { %p34_p4 = scmp.ge.s32.totalorder %s37_s6, 4  }
 0x659   :  { %36 = sbr.rel (!%p34_p4) target bundleno = 11 (0xb), region = 156 }

</bundles_post_ra>
